<compile_context>
chip_gen: v7x
topology: tpu7x:2x2x1
jax: 0.10.0
libtpu: 0.0.40
codegen_flags: <defaults>
</compile_context>

<pallas_src>
import jax
import jax.numpy as jnp
from jax import lax
from jax.experimental import pallas as pl
from jax.experimental.pallas import tpu as pltpu

K = 7   # spatial conv kernel size
P = 3   # spatial conv padding


def _block_batch(B: int) -> int:
    """Batch elements per grid step; keep >= 2 grid steps for v7x's 2 TCs."""
    if B <= 2:
        return 1
    tb = B // 2
    while B % tb:
        tb -= 1
    return tb


def _make_weight_mask_table(conv_w, H, W):
    """(K*K, 2, H*W) table: conv weight * zero-padding validity mask."""
    HW = H * W
    pos = jnp.arange(HW, dtype=jnp.int32)
    row = pos // W
    col = pos % W
    tabs = []
    for kh in range(K):
        dh = kh - P
        rok = (row + dh >= 0) & (row + dh < H)
        for kw in range(K):
            dw = kw - P
            cok = (col + dw >= 0) & (col + dw < W)
            mask = (rok & cok).astype(jnp.float32)            # (HW,)
            wvec = conv_w[0, :, kh, kw].astype(jnp.float32)   # (2,)
            tabs.append(wvec[:, None] * mask[None, :])        # (2, HW)
    return jnp.stack(tabs, axis=0)                            # (K*K, 2, HW)


def cbam_attention(x, w1, b1, w2, b2, conv_w, conv_b):
    """x: (B, C, H, W) f32 (NCHW, same as the PyTorch module)."""
    B, C, H, W = x.shape
    HW = H * W
    Cr = w1.shape[0]
    TB = _block_batch(B)

    x2 = x.reshape(B, C, HW).astype(jnp.float32)
    b1c = b1.reshape(Cr, 1).astype(jnp.float32)
    b2c = b2.reshape(C, 1).astype(jnp.float32)
    wmask = _make_weight_mask_table(conv_w, H, W)             # (49, 2, HW)
    cb = conv_b.reshape(1).astype(jnp.float32)                # (1,) SMEM scalar

    def kernel(x_ref, w1_ref, b1_ref, w2_ref, b2_ref, wm_ref, cb_ref, o_ref):
        w1_v = w1_ref[...]
        b1_v = b1_ref[...]
        w2_v = w2_ref[...]
        b2_v = b2_ref[...]
        bias = cb_ref[0]

        # iota-based selectors (hoisted out of the per-element loop)
        lane2 = lax.broadcasted_iota(jnp.int32, (C, 2), 1)    # column id 0/1
        sub2 = lax.broadcasted_iota(jnp.int32, (2, HW), 0)    # row id 0/1

        for t in range(TB):                                   # static, small
            x_t = x_ref[t]                                    # (C, HW)

            # ---- channel attention: fused mean/max squeeze + 2-matmul MLP --
            red_mean = jnp.mean(x_t, axis=1, keepdims=True)   # (C, 1)
            red_max = jnp.max(x_t, axis=1, keepdims=True)     # (C, 1)
            red = jnp.where(lane2 == 0, red_mean, red_max)    # (C, 2)

            h = jnp.dot(w1_v, red, preferred_element_type=jnp.float32) + b1_v
            h = jnp.maximum(h, 0.0)                           # (Cr, 2)
            e = jnp.dot(w2_v, h, preferred_element_type=jnp.float32) + b2_v
            exc = jax.nn.sigmoid(jnp.sum(e, axis=1, keepdims=True))  # (C, 1)
            att1 = exc * x_t                                  # (C, HW)

            # ---- spatial attention: 7x7 conv as rolls + weight*mask table --
            feat_mean = jnp.mean(att1, axis=0, keepdims=True)  # (1, HW)
            feat_max = jnp.max(att1, axis=0, keepdims=True)    # (1, HW)
            feat = jnp.where(sub2 == 0, feat_mean, feat_max)   # (2, HW)

            acc = jnp.zeros((2, HW), jnp.float32)
            for kh in range(K):
                for kw in range(K):
                    shift = (-((kh - P) * W + (kw - P))) % HW
                    rolled = feat if shift == 0 else pltpu.roll(feat, shift, axis=1)
                    acc = acc + rolled * wm_ref[kh * K + kw]   # (2, HW) fma

            conv = jnp.sum(acc, axis=0, keepdims=True) + bias  # (1, HW)
            att_sp = jax.nn.sigmoid(conv)                      # (1, HW)

            o_ref[t] = att1 * att_sp                           # (C, HW) lane-dense store

    out2 = pl.pallas_call(
        kernel,
        out_shape=jax.ShapeDtypeStruct((B, C, HW), jnp.float32),
        grid_spec=pltpu.PrefetchScalarGridSpec(
            num_scalar_prefetch=0,
            grid=(B // TB,),
            in_specs=[
                pl.BlockSpec((TB, C, HW), lambda g: (g, 0, 0)),      # x block
                pl.BlockSpec((Cr, C), lambda g: (0, 0)),             # w1
                pl.BlockSpec((Cr, 1), lambda g: (0, 0)),             # b1
                pl.BlockSpec((C, Cr), lambda g: (0, 0)),             # w2
                pl.BlockSpec((C, 1), lambda g: (0, 0)),              # b2
                pl.BlockSpec((K * K, 2, HW), lambda g: (0, 0, 0)),   # weight*mask
                pl.BlockSpec(memory_space=pltpu.MemorySpace.SMEM),   # conv bias
            ],
            out_specs=pl.BlockSpec((TB, C, HW), lambda g: (g, 0, 0)),
        ),
        compiler_params=pltpu.CompilerParams(
            dimension_semantics=("parallel",)),
    )(x2, w1.astype(jnp.float32), b1c, w2.astype(jnp.float32), b2c, wmask, cb)

    return out2.reshape(B, C, H, W)


def cbam_reference(x, w1, b1, w2, b2, conv_w, conv_b):
    """Pure-JAX reference mirroring the PyTorch forward."""
    hi = lax.Precision.HIGHEST
    red_mean = jnp.mean(x, axis=(2, 3))
    red_max = jnp.max(x, axis=(2, 3))

    def mlp(v):
        h = jnp.maximum(jnp.dot(v, w1.T, precision=hi) + b1, 0.0)
        return jnp.dot(h, w2.T, precision=hi) + b2

    exc = jax.nn.sigmoid(mlp(red_mean) + mlp(red_max))
    att1 = exc[:, :, None, None] * x
    feat1 = jnp.mean(att1, axis=1, keepdims=True)
    feat2 = jnp.max(att1, axis=1, keepdims=True)
    feat = jnp.concatenate([feat1, feat2], axis=1)
    conv = lax.conv_general_dilated(
        feat, conv_w, window_strides=(1, 1), padding=((3, 3), (3, 3)),
        dimension_numbers=("NCHW", "OIHW", "NCHW"), precision=hi)
    conv = conv + conv_b[None, :, None, None]
    att_chan = jax.nn.sigmoid(conv)
    return att1 * att_chan


if __name__ == "__main__":
    B, C, H, W = 2, 32, 16, 16   # channels_in=32, rate=4
    rate = 4
    Cr = C // rate

    key = jax.random.PRNGKey(0)
    ks = jax.random.split(key, 7)
    x = jax.random.normal(ks[0], (B, C, H, W), jnp.float32)
    w1 = jax.random.normal(ks[1], (Cr, C), jnp.float32) * 0.1
    b1 = jax.random.normal(ks[2], (Cr,), jnp.float32) * 0.1
    w2 = jax.random.normal(ks[3], (C, Cr), jnp.float32) * 0.1
    b2 = jax.random.normal(ks[4], (C,), jnp.float32) * 0.1
    conv_w = jax.random.normal(ks[5], (1, 2, 7, 7), jnp.float32) * 0.1
    conv_b = jax.random.normal(ks[6], (1,), jnp.float32) * 0.1

    out = cbam_attention(x, w1, b1, w2, b2, conv_w, conv_b)
    out = jax.block_until_ready(out)

    ref = cbam_reference(x, w1, b1, w2, b2, conv_w, conv_b)
    err = float(jnp.max(jnp.abs(out - ref)))
    assert out.shape == (B, C, H, W)
    assert err < 1e-3, f"max abs err too large: {err}"

    print("KERNEL_OK")
</pallas_src>

<mosaic_0001>
module attributes {stable_mosaic.version = 11 : i64} {
  func.func @kernel(%arg0: i32, %arg1: memref<1x32x256xf32, #tpu.memory_space<vmem>>, %arg2: memref<8x32xf32, #tpu.memory_space<vmem>>, %arg3: memref<8x1xf32, #tpu.memory_space<vmem>>, %arg4: memref<32x8xf32, #tpu.memory_space<vmem>>, %arg5: memref<32x1xf32, #tpu.memory_space<vmem>>, %arg6: memref<49x2x256xf32, #tpu.memory_space<vmem>>, %arg7: memref<1xf32, #tpu.memory_space<smem>>, %arg8: memref<1x32x256xf32, #tpu.memory_space<vmem>>) attributes {dimension_semantics = [#tpu.dimension_semantics<parallel>], iteration_bounds = array<i64: 2>, scalar_prefetch = 0 : i64, scratch_operands = 0 : i64, tpu.core_type = #tpu.core_type<tc>, window_params = [{transform_indices = @transform_0, window_bounds = array<i64: 1, 32, 256>}, {pipeline_mode = #tpu.pipeline_mode<synchronous>, transform_indices = @transform_1, window_bounds = array<i64: 8, 32>}, {pipeline_mode = #tpu.pipeline_mode<synchronous>, transform_indices = @transform_2, window_bounds = array<i64: 8, 1>}, {pipeline_mode = #tpu.pipeline_mode<synchronous>, transform_indices = @transform_3, window_bounds = array<i64: 32, 8>}, {pipeline_mode = #tpu.pipeline_mode<synchronous>, transform_indices = @transform_4, window_bounds = array<i64: 32, 1>}, {pipeline_mode = #tpu.pipeline_mode<synchronous>, transform_indices = @transform_5, window_bounds = array<i64: 49, 2, 256>}, {transform_indices = @transform_6, window_bounds = array<i64: 1>}, {transform_indices = @transform_7, window_bounds = array<i64: 1, 32, 256>}]} {
    %c0 = arith.constant 0 : index
    %c0_0 = arith.constant 0 : index
    %0 = vector.load %arg2[%c0, %c0_0] : memref<8x32xf32, #tpu.memory_space<vmem>>, vector<8x32xf32>
    %c0_1 = arith.constant 0 : index
    %c0_2 = arith.constant 0 : index
    %1 = vector.load %arg3[%c0_1, %c0_2] : memref<8x1xf32, #tpu.memory_space<vmem>>, vector<8x1xf32>
    %c0_3 = arith.constant 0 : index
    %c0_4 = arith.constant 0 : index
    %2 = vector.load %arg4[%c0_3, %c0_4] : memref<32x8xf32, #tpu.memory_space<vmem>>, vector<32x8xf32>
    %c0_5 = arith.constant 0 : index
    %c0_6 = arith.constant 0 : index
    %3 = vector.load %arg5[%c0_5, %c0_6] : memref<32x1xf32, #tpu.memory_space<vmem>>, vector<32x1xf32>
    %c0_7 = arith.constant 0 : index
    %4 = memref.load %arg7[%c0_7] : memref<1xf32, #tpu.memory_space<smem>>
    %5 = tpu.iota {dimensions = array<i32: 1>} : vector<32x2xi32>
    %6 = tpu.iota {dimensions = array<i32: 0>} : vector<2x256xi32>
    %c0_8 = arith.constant 0 : index
    %c0_9 = arith.constant 0 : index
    %c0_10 = arith.constant 0 : index
    %7 = vector.load %arg1[%c0_8, %c0_9, %c0_10] : memref<1x32x256xf32, #tpu.memory_space<vmem>>, vector<1x32x256xf32>
    %8 = vector.shape_cast %7 : vector<1x32x256xf32> to vector<32x256xf32>
    %cst = arith.constant dense<0.000000e+00> : vector<32xf32>
    %9 = vector.multi_reduction <add>, %8, %cst [1] : vector<32x256xf32> to vector<32xf32>
    %10 = vector.shape_cast %9 : vector<32xf32> to vector<32x1xf32>
    %cst_11 = arith.constant 2.560000e+02 : f32
    %11 = vector.broadcast %cst_11 : f32 to vector<32x1xf32>
    %12 = arith.divf %10, %11 : vector<32x1xf32>
    %cst_12 = arith.constant dense<0xFF800000> : vector<32xf32>
    %13 = vector.multi_reduction <maximumf>, %8, %cst_12 [1] : vector<32x256xf32> to vector<32xf32>
    %14 = vector.shape_cast %13 : vector<32xf32> to vector<32x1xf32>
    %c0_i32 = arith.constant 0 : i32
    %15 = vector.broadcast %c0_i32 : i32 to vector<32x2xi32>
    %16 = arith.cmpi eq, %5, %15 : vector<32x2xi32>
    %17 = vector.shape_cast %12 : vector<32x1xf32> to vector<32x1xf32>
    %18 = vector.broadcast %17 : vector<32x1xf32> to vector<32x2xf32>
    %19 = vector.shape_cast %14 : vector<32x1xf32> to vector<32x1xf32>
    %20 = vector.broadcast %19 : vector<32x1xf32> to vector<32x2xf32>
    %21 = arith.select %16, %18, %20 : vector<32x2xi1>, vector<32x2xf32>
    %cst_13 = arith.constant dense<0.000000e+00> : vector<8x2xf32>
    %22 = tpu.matmul %0, %21, %cst_13 {dimension_numbers = #tpu.dot_dimension_numbers<[1], [0], [0], [1], [0, 0, 1, 1], [], []>} : vector<8x32xf32>, vector<32x2xf32>, vector<8x2xf32> -> vector<8x2xf32>
    %23 = vector.broadcast %1 : vector<8x1xf32> to vector<8x2xf32>
    %24 = arith.addf %22, %23 : vector<8x2xf32>
    %cst_14 = arith.constant 0.000000e+00 : f32
    %25 = vector.broadcast %cst_14 : f32 to vector<8x2xf32>
    %26 = arith.maximumf %24, %25 : vector<8x2xf32>
    %cst_15 = arith.constant dense<0.000000e+00> : vector<32x2xf32>
    %27 = tpu.matmul %2, %26, %cst_15 {dimension_numbers = #tpu.dot_dimension_numbers<[1], [0], [0], [1], [0, 0, 1, 1], [], []>} : vector<32x8xf32>, vector<8x2xf32>, vector<32x2xf32> -> vector<32x2xf32>
    %28 = vector.broadcast %3 : vector<32x1xf32> to vector<32x2xf32>
    %29 = arith.addf %27, %28 : vector<32x2xf32>
    %cst_16 = arith.constant dense<0.000000e+00> : vector<32xf32>
    %30 = vector.multi_reduction <add>, %29, %cst_16 [1] : vector<32x2xf32> to vector<32xf32>
    %31 = vector.shape_cast %30 : vector<32xf32> to vector<32x1xf32>
    %32 = arith.negf %31 : vector<32x1xf32>
    %33 = math.exp %32 : vector<32x1xf32>
    %cst_17 = arith.constant 1.000000e+00 : f32
    %34 = vector.broadcast %cst_17 : f32 to vector<32x1xf32>
    %35 = arith.addf %34, %33 : vector<32x1xf32>
    %36 = arith.divf %34, %35 : vector<32x1xf32>
    %37 = vector.broadcast %36 : vector<32x1xf32> to vector<32x256xf32>
    %38 = arith.mulf %37, %8 : vector<32x256xf32>
    %cst_18 = arith.constant dense<0.000000e+00> : vector<256xf32>
    %39 = vector.multi_reduction <add>, %38, %cst_18 [0] : vector<32x256xf32> to vector<256xf32>
    %40 = vector.shape_cast %39 : vector<256xf32> to vector<1x256xf32>
    %cst_19 = arith.constant 3.200000e+01 : f32
    %41 = vector.broadcast %cst_19 : f32 to vector<1x256xf32>
    %42 = arith.divf %40, %41 : vector<1x256xf32>
    %cst_20 = arith.constant dense<0xFF800000> : vector<256xf32>
    %43 = vector.multi_reduction <maximumf>, %38, %cst_20 [0] : vector<32x256xf32> to vector<256xf32>
    %44 = vector.shape_cast %43 : vector<256xf32> to vector<1x256xf32>
    %c0_i32_21 = arith.constant 0 : i32
    %45 = vector.broadcast %c0_i32_21 : i32 to vector<2x256xi32>
    %46 = arith.cmpi eq, %6, %45 : vector<2x256xi32>
    %47 = vector.shape_cast %42 : vector<1x256xf32> to vector<1x256xf32>
    %48 = vector.broadcast %47 : vector<1x256xf32> to vector<2x256xf32>
    %49 = vector.shape_cast %44 : vector<1x256xf32> to vector<1x256xf32>
    %50 = vector.broadcast %49 : vector<1x256xf32> to vector<2x256xf32>
    %51 = arith.select %46, %48, %50 : vector<2x256xi1>, vector<2x256xf32>
    %cst_22 = arith.constant 0.000000e+00 : f32
    %52 = vector.broadcast %cst_22 : f32 to vector<2x256xf32>
    %c51_i32 = arith.constant 51 : i32
    %53 = tpu.dynamic_rotate %51 by %c51_i32 dim 1 : vector<2x256xf32>, i32 -> vector<2x256xf32>
    %c0_23 = arith.constant 0 : index
    %c0_24 = arith.constant 0 : index
    %c0_25 = arith.constant 0 : index
    %54 = vector.load %arg6[%c0_23, %c0_24, %c0_25] : memref<49x2x256xf32, #tpu.memory_space<vmem>>, vector<1x2x256xf32>
    %55 = vector.shape_cast %54 : vector<1x2x256xf32> to vector<2x256xf32>
    %56 = arith.mulf %53, %55 : vector<2x256xf32>
    %57 = arith.addf %52, %56 : vector<2x256xf32>
    %c50_i32 = arith.constant 50 : i32
    %58 = tpu.dynamic_rotate %51 by %c50_i32 dim 1 : vector<2x256xf32>, i32 -> vector<2x256xf32>
    %c1 = arith.constant 1 : index
    %c0_26 = arith.constant 0 : index
    %c0_27 = arith.constant 0 : index
    %59 = vector.load %arg6[%c1, %c0_26, %c0_27] : memref<49x2x256xf32, #tpu.memory_space<vmem>>, vector<1x2x256xf32>
    %60 = vector.shape_cast %59 : vector<1x2x256xf32> to vector<2x256xf32>
    %61 = arith.mulf %58, %60 : vector<2x256xf32>
    %62 = arith.addf %57, %61 : vector<2x256xf32>
    %c49_i32 = arith.constant 49 : i32
    %63 = tpu.dynamic_rotate %51 by %c49_i32 dim 1 : vector<2x256xf32>, i32 -> vector<2x256xf32>
    %c2 = arith.constant 2 : index
    %c0_28 = arith.constant 0 : index
    %c0_29 = arith.constant 0 : index
    %64 = vector.load %arg6[%c2, %c0_28, %c0_29] : memref<49x2x256xf32, #tpu.memory_space<vmem>>, vector<1x2x256xf32>
    %65 = vector.shape_cast %64 : vector<1x2x256xf32> to vector<2x256xf32>
    %66 = arith.mulf %63, %65 : vector<2x256xf32>
    %67 = arith.addf %62, %66 : vector<2x256xf32>
    %c48_i32 = arith.constant 48 : i32
    %68 = tpu.dynamic_rotate %51 by %c48_i32 dim 1 : vector<2x256xf32>, i32 -> vector<2x256xf32>
    %c3 = arith.constant 3 : index
    %c0_30 = arith.constant 0 : index
    %c0_31 = arith.constant 0 : index
    %69 = vector.load %arg6[%c3, %c0_30, %c0_31] : memref<49x2x256xf32, #tpu.memory_space<vmem>>, vector<1x2x256xf32>
    %70 = vector.shape_cast %69 : vector<1x2x256xf32> to vector<2x256xf32>
    %71 = arith.mulf %68, %70 : vector<2x256xf32>
    %72 = arith.addf %67, %71 : vector<2x256xf32>
    %c47_i32 = arith.constant 47 : i32
    %73 = tpu.dynamic_rotate %51 by %c47_i32 dim 1 : vector<2x256xf32>, i32 -> vector<2x256xf32>
    %c4 = arith.constant 4 : index
    %c0_32 = arith.constant 0 : index
    %c0_33 = arith.constant 0 : index
    %74 = vector.load %arg6[%c4, %c0_32, %c0_33] : memref<49x2x256xf32, #tpu.memory_space<vmem>>, vector<1x2x256xf32>
    %75 = vector.shape_cast %74 : vector<1x2x256xf32> to vector<2x256xf32>
    %76 = arith.mulf %73, %75 : vector<2x256xf32>
    %77 = arith.addf %72, %76 : vector<2x256xf32>
    %c46_i32 = arith.constant 46 : i32
    %78 = tpu.dynamic_rotate %51 by %c46_i32 dim 1 : vector<2x256xf32>, i32 -> vector<2x256xf32>
    %c5 = arith.constant 5 : index
    %c0_34 = arith.constant 0 : index
    %c0_35 = arith.constant 0 : index
    %79 = vector.load %arg6[%c5, %c0_34, %c0_35] : memref<49x2x256xf32, #tpu.memory_space<vmem>>, vector<1x2x256xf32>
    %80 = vector.shape_cast %79 : vector<1x2x256xf32> to vector<2x256xf32>
    %81 = arith.mulf %78, %80 : vector<2x256xf32>
    %82 = arith.addf %77, %81 : vector<2x256xf32>
    %c45_i32 = arith.constant 45 : i32
    %83 = tpu.dynamic_rotate %51 by %c45_i32 dim 1 : vector<2x256xf32>, i32 -> vector<2x256xf32>
    %c6 = arith.constant 6 : index
    %c0_36 = arith.constant 0 : index
    %c0_37 = arith.constant 0 : index
    %84 = vector.load %arg6[%c6, %c0_36, %c0_37] : memref<49x2x256xf32, #tpu.memory_space<vmem>>, vector<1x2x256xf32>
    %85 = vector.shape_cast %84 : vector<1x2x256xf32> to vector<2x256xf32>
    %86 = arith.mulf %83, %85 : vector<2x256xf32>
    %87 = arith.addf %82, %86 : vector<2x256xf32>
    %c35_i32 = arith.constant 35 : i32
    %88 = tpu.dynamic_rotate %51 by %c35_i32 dim 1 : vector<2x256xf32>, i32 -> vector<2x256xf32>
    %c7 = arith.constant 7 : index
    %c0_38 = arith.constant 0 : index
    %c0_39 = arith.constant 0 : index
    %89 = vector.load %arg6[%c7, %c0_38, %c0_39] : memref<49x2x256xf32, #tpu.memory_space<vmem>>, vector<1x2x256xf32>
    %90 = vector.shape_cast %89 : vector<1x2x256xf32> to vector<2x256xf32>
    %91 = arith.mulf %88, %90 : vector<2x256xf32>
    %92 = arith.addf %87, %91 : vector<2x256xf32>
    %c34_i32 = arith.constant 34 : i32
    %93 = tpu.dynamic_rotate %51 by %c34_i32 dim 1 : vector<2x256xf32>, i32 -> vector<2x256xf32>
    %c8 = arith.constant 8 : index
    %c0_40 = arith.constant 0 : index
    %c0_41 = arith.constant 0 : index
    %94 = vector.load %arg6[%c8, %c0_40, %c0_41] : memref<49x2x256xf32, #tpu.memory_space<vmem>>, vector<1x2x256xf32>
    %95 = vector.shape_cast %94 : vector<1x2x256xf32> to vector<2x256xf32>
    %96 = arith.mulf %93, %95 : vector<2x256xf32>
    %97 = arith.addf %92, %96 : vector<2x256xf32>
    %c33_i32 = arith.constant 33 : i32
    %98 = tpu.dynamic_rotate %51 by %c33_i32 dim 1 : vector<2x256xf32>, i32 -> vector<2x256xf32>
    %c9 = arith.constant 9 : index
    %c0_42 = arith.constant 0 : index
    %c0_43 = arith.constant 0 : index
    %99 = vector.load %arg6[%c9, %c0_42, %c0_43] : memref<49x2x256xf32, #tpu.memory_space<vmem>>, vector<1x2x256xf32>
    %100 = vector.shape_cast %99 : vector<1x2x256xf32> to vector<2x256xf32>
    %101 = arith.mulf %98, %100 : vector<2x256xf32>
    %102 = arith.addf %97, %101 : vector<2x256xf32>
    %c32_i32 = arith.constant 32 : i32
    %103 = tpu.dynamic_rotate %51 by %c32_i32 dim 1 : vector<2x256xf32>, i32 -> vector<2x256xf32>
    %c10 = arith.constant 10 : index
    %c0_44 = arith.constant 0 : index
    %c0_45 = arith.constant 0 : index
    %104 = vector.load %arg6[%c10, %c0_44, %c0_45] : memref<49x2x256xf32, #tpu.memory_space<vmem>>, vector<1x2x256xf32>
    %105 = vector.shape_cast %104 : vector<1x2x256xf32> to vector<2x256xf32>
    %106 = arith.mulf %103, %105 : vector<2x256xf32>
    %107 = arith.addf %102, %106 : vector<2x256xf32>
    %c31_i32 = arith.constant 31 : i32
    %108 = tpu.dynamic_rotate %51 by %c31_i32 dim 1 : vector<2x256xf32>, i32 -> vector<2x256xf32>
    %c11 = arith.constant 11 : index
    %c0_46 = arith.constant 0 : index
    %c0_47 = arith.constant 0 : index
    %109 = vector.load %arg6[%c11, %c0_46, %c0_47] : memref<49x2x256xf32, #tpu.memory_space<vmem>>, vector<1x2x256xf32>
    %110 = vector.shape_cast %109 : vector<1x2x256xf32> to vector<2x256xf32>
    %111 = arith.mulf %108, %110 : vector<2x256xf32>
    %112 = arith.addf %107, %111 : vector<2x256xf32>
    %c30_i32 = arith.constant 30 : i32
    %113 = tpu.dynamic_rotate %51 by %c30_i32 dim 1 : vector<2x256xf32>, i32 -> vector<2x256xf32>
    %c12 = arith.constant 12 : index
    %c0_48 = arith.constant 0 : index
    %c0_49 = arith.constant 0 : index
    %114 = vector.load %arg6[%c12, %c0_48, %c0_49] : memref<49x2x256xf32, #tpu.memory_space<vmem>>, vector<1x2x256xf32>
    %115 = vector.shape_cast %114 : vector<1x2x256xf32> to vector<2x256xf32>
    %116 = arith.mulf %113, %115 : vector<2x256xf32>
    %117 = arith.addf %112, %116 : vector<2x256xf32>
    %c29_i32 = arith.constant 29 : i32
    %118 = tpu.dynamic_rotate %51 by %c29_i32 dim 1 : vector<2x256xf32>, i32 -> vector<2x256xf32>
    %c13 = arith.constant 13 : index
    %c0_50 = arith.constant 0 : index
    %c0_51 = arith.constant 0 : index
    %119 = vector.load %arg6[%c13, %c0_50, %c0_51] : memref<49x2x256xf32, #tpu.memory_space<vmem>>, vector<1x2x256xf32>
    %120 = vector.shape_cast %119 : vector<1x2x256xf32> to vector<2x256xf32>
    %121 = arith.mulf %118, %120 : vector<2x256xf32>
    %122 = arith.addf %117, %121 : vector<2x256xf32>
    %c19_i32 = arith.constant 19 : i32
    %123 = tpu.dynamic_rotate %51 by %c19_i32 dim 1 : vector<2x256xf32>, i32 -> vector<2x256xf32>
    %c14 = arith.constant 14 : index
    %c0_52 = arith.constant 0 : index
    %c0_53 = arith.constant 0 : index
    %124 = vector.load %arg6[%c14, %c0_52, %c0_53] : memref<49x2x256xf32, #tpu.memory_space<vmem>>, vector<1x2x256xf32>
    %125 = vector.shape_cast %124 : vector<1x2x256xf32> to vector<2x256xf32>
    %126 = arith.mulf %123, %125 : vector<2x256xf32>
    %127 = arith.addf %122, %126 : vector<2x256xf32>
    %c18_i32 = arith.constant 18 : i32
    %128 = tpu.dynamic_rotate %51 by %c18_i32 dim 1 : vector<2x256xf32>, i32 -> vector<2x256xf32>
    %c15 = arith.constant 15 : index
    %c0_54 = arith.constant 0 : index
    %c0_55 = arith.constant 0 : index
    %129 = vector.load %arg6[%c15, %c0_54, %c0_55] : memref<49x2x256xf32, #tpu.memory_space<vmem>>, vector<1x2x256xf32>
    %130 = vector.shape_cast %129 : vector<1x2x256xf32> to vector<2x256xf32>
    %131 = arith.mulf %128, %130 : vector<2x256xf32>
    %132 = arith.addf %127, %131 : vector<2x256xf32>
    %c17_i32 = arith.constant 17 : i32
    %133 = tpu.dynamic_rotate %51 by %c17_i32 dim 1 : vector<2x256xf32>, i32 -> vector<2x256xf32>
    %c16 = arith.constant 16 : index
    %c0_56 = arith.constant 0 : index
    %c0_57 = arith.constant 0 : index
    %134 = vector.load %arg6[%c16, %c0_56, %c0_57] : memref<49x2x256xf32, #tpu.memory_space<vmem>>, vector<1x2x256xf32>
    %135 = vector.shape_cast %134 : vector<1x2x256xf32> to vector<2x256xf32>
    %136 = arith.mulf %133, %135 : vector<2x256xf32>
    %137 = arith.addf %132, %136 : vector<2x256xf32>
    %c16_i32 = arith.constant 16 : i32
    %138 = tpu.dynamic_rotate %51 by %c16_i32 dim 1 : vector<2x256xf32>, i32 -> vector<2x256xf32>
    %c17 = arith.constant 17 : index
    %c0_58 = arith.constant 0 : index
    %c0_59 = arith.constant 0 : index
    %139 = vector.load %arg6[%c17, %c0_58, %c0_59] : memref<49x2x256xf32, #tpu.memory_space<vmem>>, vector<1x2x256xf32>
    %140 = vector.shape_cast %139 : vector<1x2x256xf32> to vector<2x256xf32>
    %141 = arith.mulf %138, %140 : vector<2x256xf32>
    %142 = arith.addf %137, %141 : vector<2x256xf32>
    %c15_i32 = arith.constant 15 : i32
    %143 = tpu.dynamic_rotate %51 by %c15_i32 dim 1 : vector<2x256xf32>, i32 -> vector<2x256xf32>
    %c18 = arith.constant 18 : index
    %c0_60 = arith.constant 0 : index
    %c0_61 = arith.constant 0 : index
    %144 = vector.load %arg6[%c18, %c0_60, %c0_61] : memref<49x2x256xf32, #tpu.memory_space<vmem>>, vector<1x2x256xf32>
    %145 = vector.shape_cast %144 : vector<1x2x256xf32> to vector<2x256xf32>
    %146 = arith.mulf %143, %145 : vector<2x256xf32>
    %147 = arith.addf %142, %146 : vector<2x256xf32>
    %c14_i32 = arith.constant 14 : i32
    %148 = tpu.dynamic_rotate %51 by %c14_i32 dim 1 : vector<2x256xf32>, i32 -> vector<2x256xf32>
    %c19 = arith.constant 19 : index
    %c0_62 = arith.constant 0 : index
    %c0_63 = arith.constant 0 : index
    %149 = vector.load %arg6[%c19, %c0_62, %c0_63] : memref<49x2x256xf32, #tpu.memory_space<vmem>>, vector<1x2x256xf32>
    %150 = vector.shape_cast %149 : vector<1x2x256xf32> to vector<2x256xf32>
    %151 = arith.mulf %148, %150 : vector<2x256xf32>
    %152 = arith.addf %147, %151 : vector<2x256xf32>
    %c13_i32 = arith.constant 13 : i32
    %153 = tpu.dynamic_rotate %51 by %c13_i32 dim 1 : vector<2x256xf32>, i32 -> vector<2x256xf32>
    %c20 = arith.constant 20 : index
    %c0_64 = arith.constant 0 : index
    %c0_65 = arith.constant 0 : index
    %154 = vector.load %arg6[%c20, %c0_64, %c0_65] : memref<49x2x256xf32, #tpu.memory_space<vmem>>, vector<1x2x256xf32>
    %155 = vector.shape_cast %154 : vector<1x2x256xf32> to vector<2x256xf32>
    %156 = arith.mulf %153, %155 : vector<2x256xf32>
    %157 = arith.addf %152, %156 : vector<2x256xf32>
    %c3_i32 = arith.constant 3 : i32
    %158 = tpu.dynamic_rotate %51 by %c3_i32 dim 1 : vector<2x256xf32>, i32 -> vector<2x256xf32>
    %c21 = arith.constant 21 : index
    %c0_66 = arith.constant 0 : index
    %c0_67 = arith.constant 0 : index
    %159 = vector.load %arg6[%c21, %c0_66, %c0_67] : memref<49x2x256xf32, #tpu.memory_space<vmem>>, vector<1x2x256xf32>
    %160 = vector.shape_cast %159 : vector<1x2x256xf32> to vector<2x256xf32>
    %161 = arith.mulf %158, %160 : vector<2x256xf32>
    %162 = arith.addf %157, %161 : vector<2x256xf32>
    %c2_i32 = arith.constant 2 : i32
    %163 = tpu.dynamic_rotate %51 by %c2_i32 dim 1 : vector<2x256xf32>, i32 -> vector<2x256xf32>
    %c22 = arith.constant 22 : index
    %c0_68 = arith.constant 0 : index
    %c0_69 = arith.constant 0 : index
    %164 = vector.load %arg6[%c22, %c0_68, %c0_69] : memref<49x2x256xf32, #tpu.memory_space<vmem>>, vector<1x2x256xf32>
    %165 = vector.shape_cast %164 : vector<1x2x256xf32> to vector<2x256xf32>
    %166 = arith.mulf %163, %165 : vector<2x256xf32>
    %167 = arith.addf %162, %166 : vector<2x256xf32>
    %c1_i32 = arith.constant 1 : i32
    %168 = tpu.dynamic_rotate %51 by %c1_i32 dim 1 : vector<2x256xf32>, i32 -> vector<2x256xf32>
    %c23 = arith.constant 23 : index
    %c0_70 = arith.constant 0 : index
    %c0_71 = arith.constant 0 : index
    %169 = vector.load %arg6[%c23, %c0_70, %c0_71] : memref<49x2x256xf32, #tpu.memory_space<vmem>>, vector<1x2x256xf32>
    %170 = vector.shape_cast %169 : vector<1x2x256xf32> to vector<2x256xf32>
    %171 = arith.mulf %168, %170 : vector<2x256xf32>
    %172 = arith.addf %167, %171 : vector<2x256xf32>
    %c24 = arith.constant 24 : index
    %c0_72 = arith.constant 0 : index
    %c0_73 = arith.constant 0 : index
    %173 = vector.load %arg6[%c24, %c0_72, %c0_73] : memref<49x2x256xf32, #tpu.memory_space<vmem>>, vector<1x2x256xf32>
    %174 = vector.shape_cast %173 : vector<1x2x256xf32> to vector<2x256xf32>
    %175 = arith.mulf %51, %174 : vector<2x256xf32>
    %176 = arith.addf %172, %175 : vector<2x256xf32>
    %c255_i32 = arith.constant 255 : i32
    %177 = tpu.dynamic_rotate %51 by %c255_i32 dim 1 : vector<2x256xf32>, i32 -> vector<2x256xf32>
    %c25 = arith.constant 25 : index
    %c0_74 = arith.constant 0 : index
    %c0_75 = arith.constant 0 : index
    %178 = vector.load %arg6[%c25, %c0_74, %c0_75] : memref<49x2x256xf32, #tpu.memory_space<vmem>>, vector<1x2x256xf32>
    %179 = vector.shape_cast %178 : vector<1x2x256xf32> to vector<2x256xf32>
    %180 = arith.mulf %177, %179 : vector<2x256xf32>
    %181 = arith.addf %176, %180 : vector<2x256xf32>
    %c254_i32 = arith.constant 254 : i32
    %182 = tpu.dynamic_rotate %51 by %c254_i32 dim 1 : vector<2x256xf32>, i32 -> vector<2x256xf32>
    %c26 = arith.constant 26 : index
    %c0_76 = arith.constant 0 : index
    %c0_77 = arith.constant 0 : index
    %183 = vector.load %arg6[%c26, %c0_76, %c0_77] : memref<49x2x256xf32, #tpu.memory_space<vmem>>, vector<1x2x256xf32>
    %184 = vector.shape_cast %183 : vector<1x2x256xf32> to vector<2x256xf32>
    %185 = arith.mulf %182, %184 : vector<2x256xf32>
    %186 = arith.addf %181, %185 : vector<2x256xf32>
    %c253_i32 = arith.constant 253 : i32
    %187 = tpu.dynamic_rotate %51 by %c253_i32 dim 1 : vector<2x256xf32>, i32 -> vector<2x256xf32>
    %c27 = arith.constant 27 : index
    %c0_78 = arith.constant 0 : index
    %c0_79 = arith.constant 0 : index
    %188 = vector.load %arg6[%c27, %c0_78, %c0_79] : memref<49x2x256xf32, #tpu.memory_space<vmem>>, vector<1x2x256xf32>
    %189 = vector.shape_cast %188 : vector<1x2x256xf32> to vector<2x256xf32>
    %190 = arith.mulf %187, %189 : vector<2x256xf32>
    %191 = arith.addf %186, %190 : vector<2x256xf32>
    %c243_i32 = arith.constant 243 : i32
    %192 = tpu.dynamic_rotate %51 by %c243_i32 dim 1 : vector<2x256xf32>, i32 -> vector<2x256xf32>
    %c28 = arith.constant 28 : index
    %c0_80 = arith.constant 0 : index
    %c0_81 = arith.constant 0 : index
    %193 = vector.load %arg6[%c28, %c0_80, %c0_81] : memref<49x2x256xf32, #tpu.memory_space<vmem>>, vector<1x2x256xf32>
    %194 = vector.shape_cast %193 : vector<1x2x256xf32> to vector<2x256xf32>
    %195 = arith.mulf %192, %194 : vector<2x256xf32>
    %196 = arith.addf %191, %195 : vector<2x256xf32>
    %c242_i32 = arith.constant 242 : i32
    %197 = tpu.dynamic_rotate %51 by %c242_i32 dim 1 : vector<2x256xf32>, i32 -> vector<2x256xf32>
    %c29 = arith.constant 29 : index
    %c0_82 = arith.constant 0 : index
    %c0_83 = arith.constant 0 : index
    %198 = vector.load %arg6[%c29, %c0_82, %c0_83] : memref<49x2x256xf32, #tpu.memory_space<vmem>>, vector<1x2x256xf32>
    %199 = vector.shape_cast %198 : vector<1x2x256xf32> to vector<2x256xf32>
    %200 = arith.mulf %197, %199 : vector<2x256xf32>
    %201 = arith.addf %196, %200 : vector<2x256xf32>
    %c241_i32 = arith.constant 241 : i32
    %202 = tpu.dynamic_rotate %51 by %c241_i32 dim 1 : vector<2x256xf32>, i32 -> vector<2x256xf32>
    %c30 = arith.constant 30 : index
    %c0_84 = arith.constant 0 : index
    %c0_85 = arith.constant 0 : index
    %203 = vector.load %arg6[%c30, %c0_84, %c0_85] : memref<49x2x256xf32, #tpu.memory_space<vmem>>, vector<1x2x256xf32>
    %204 = vector.shape_cast %203 : vector<1x2x256xf32> to vector<2x256xf32>
    %205 = arith.mulf %202, %204 : vector<2x256xf32>
    %206 = arith.addf %201, %205 : vector<2x256xf32>
    %c240_i32 = arith.constant 240 : i32
    %207 = tpu.dynamic_rotate %51 by %c240_i32 dim 1 : vector<2x256xf32>, i32 -> vector<2x256xf32>
    %c31 = arith.constant 31 : index
    %c0_86 = arith.constant 0 : index
    %c0_87 = arith.constant 0 : index
    %208 = vector.load %arg6[%c31, %c0_86, %c0_87] : memref<49x2x256xf32, #tpu.memory_space<vmem>>, vector<1x2x256xf32>
    %209 = vector.shape_cast %208 : vector<1x2x256xf32> to vector<2x256xf32>
    %210 = arith.mulf %207, %209 : vector<2x256xf32>
    %211 = arith.addf %206, %210 : vector<2x256xf32>
    %c239_i32 = arith.constant 239 : i32
    %212 = tpu.dynamic_rotate %51 by %c239_i32 dim 1 : vector<2x256xf32>, i32 -> vector<2x256xf32>
    %c32 = arith.constant 32 : index
    %c0_88 = arith.constant 0 : index
    %c0_89 = arith.constant 0 : index
    %213 = vector.load %arg6[%c32, %c0_88, %c0_89] : memref<49x2x256xf32, #tpu.memory_space<vmem>>, vector<1x2x256xf32>
    %214 = vector.shape_cast %213 : vector<1x2x256xf32> to vector<2x256xf32>
    %215 = arith.mulf %212, %214 : vector<2x256xf32>
    %216 = arith.addf %211, %215 : vector<2x256xf32>
    %c238_i32 = arith.constant 238 : i32
    %217 = tpu.dynamic_rotate %51 by %c238_i32 dim 1 : vector<2x256xf32>, i32 -> vector<2x256xf32>
    %c33 = arith.constant 33 : index
    %c0_90 = arith.constant 0 : index
    %c0_91 = arith.constant 0 : index
    %218 = vector.load %arg6[%c33, %c0_90, %c0_91] : memref<49x2x256xf32, #tpu.memory_space<vmem>>, vector<1x2x256xf32>
    %219 = vector.shape_cast %218 : vector<1x2x256xf32> to vector<2x256xf32>
    %220 = arith.mulf %217, %219 : vector<2x256xf32>
    %221 = arith.addf %216, %220 : vector<2x256xf32>
    %c237_i32 = arith.constant 237 : i32
    %222 = tpu.dynamic_rotate %51 by %c237_i32 dim 1 : vector<2x256xf32>, i32 -> vector<2x256xf32>
    %c34 = arith.constant 34 : index
    %c0_92 = arith.constant 0 : index
    %c0_93 = arith.constant 0 : index
    %223 = vector.load %arg6[%c34, %c0_92, %c0_93] : memref<49x2x256xf32, #tpu.memory_space<vmem>>, vector<1x2x256xf32>
    %224 = vector.shape_cast %223 : vector<1x2x256xf32> to vector<2x256xf32>
    %225 = arith.mulf %222, %224 : vector<2x256xf32>
    %226 = arith.addf %221, %225 : vector<2x256xf32>
    %c227_i32 = arith.constant 227 : i32
    %227 = tpu.dynamic_rotate %51 by %c227_i32 dim 1 : vector<2x256xf32>, i32 -> vector<2x256xf32>
    %c35 = arith.constant 35 : index
    %c0_94 = arith.constant 0 : index
    %c0_95 = arith.constant 0 : index
    %228 = vector.load %arg6[%c35, %c0_94, %c0_95] : memref<49x2x256xf32, #tpu.memory_space<vmem>>, vector<1x2x256xf32>
    %229 = vector.shape_cast %228 : vector<1x2x256xf32> to vector<2x256xf32>
    %230 = arith.mulf %227, %229 : vector<2x256xf32>
    %231 = arith.addf %226, %230 : vector<2x256xf32>
    %c226_i32 = arith.constant 226 : i32
    %232 = tpu.dynamic_rotate %51 by %c226_i32 dim 1 : vector<2x256xf32>, i32 -> vector<2x256xf32>
    %c36 = arith.constant 36 : index
    %c0_96 = arith.constant 0 : index
    %c0_97 = arith.constant 0 : index
    %233 = vector.load %arg6[%c36, %c0_96, %c0_97] : memref<49x2x256xf32, #tpu.memory_space<vmem>>, vector<1x2x256xf32>
    %234 = vector.shape_cast %233 : vector<1x2x256xf32> to vector<2x256xf32>
    %235 = arith.mulf %232, %234 : vector<2x256xf32>
    %236 = arith.addf %231, %235 : vector<2x256xf32>
    %c225_i32 = arith.constant 225 : i32
    %237 = tpu.dynamic_rotate %51 by %c225_i32 dim 1 : vector<2x256xf32>, i32 -> vector<2x256xf32>
    %c37 = arith.constant 37 : index
    %c0_98 = arith.constant 0 : index
    %c0_99 = arith.constant 0 : index
    %238 = vector.load %arg6[%c37, %c0_98, %c0_99] : memref<49x2x256xf32, #tpu.memory_space<vmem>>, vector<1x2x256xf32>
    %239 = vector.shape_cast %238 : vector<1x2x256xf32> to vector<2x256xf32>
    %240 = arith.mulf %237, %239 : vector<2x256xf32>
    %241 = arith.addf %236, %240 : vector<2x256xf32>
    %c224_i32 = arith.constant 224 : i32
    %242 = tpu.dynamic_rotate %51 by %c224_i32 dim 1 : vector<2x256xf32>, i32 -> vector<2x256xf32>
    %c38 = arith.constant 38 : index
    %c0_100 = arith.constant 0 : index
    %c0_101 = arith.constant 0 : index
    %243 = vector.load %arg6[%c38, %c0_100, %c0_101] : memref<49x2x256xf32, #tpu.memory_space<vmem>>, vector<1x2x256xf32>
    %244 = vector.shape_cast %243 : vector<1x2x256xf32> to vector<2x256xf32>
    %245 = arith.mulf %242, %244 : vector<2x256xf32>
    %246 = arith.addf %241, %245 : vector<2x256xf32>
    %c223_i32 = arith.constant 223 : i32
    %247 = tpu.dynamic_rotate %51 by %c223_i32 dim 1 : vector<2x256xf32>, i32 -> vector<2x256xf32>
    %c39 = arith.constant 39 : index
    %c0_102 = arith.constant 0 : index
    %c0_103 = arith.constant 0 : index
    %248 = vector.load %arg6[%c39, %c0_102, %c0_103] : memref<49x2x256xf32, #tpu.memory_space<vmem>>, vector<1x2x256xf32>
    %249 = vector.shape_cast %248 : vector<1x2x256xf32> to vector<2x256xf32>
    %250 = arith.mulf %247, %249 : vector<2x256xf32>
    %251 = arith.addf %246, %250 : vector<2x256xf32>
    %c222_i32 = arith.constant 222 : i32
    %252 = tpu.dynamic_rotate %51 by %c222_i32 dim 1 : vector<2x256xf32>, i32 -> vector<2x256xf32>
    %c40 = arith.constant 40 : index
    %c0_104 = arith.constant 0 : index
    %c0_105 = arith.constant 0 : index
    %253 = vector.load %arg6[%c40, %c0_104, %c0_105] : memref<49x2x256xf32, #tpu.memory_space<vmem>>, vector<1x2x256xf32>
    %254 = vector.shape_cast %253 : vector<1x2x256xf32> to vector<2x256xf32>
    %255 = arith.mulf %252, %254 : vector<2x256xf32>
    %256 = arith.addf %251, %255 : vector<2x256xf32>
    %c221_i32 = arith.constant 221 : i32
    %257 = tpu.dynamic_rotate %51 by %c221_i32 dim 1 : vector<2x256xf32>, i32 -> vector<2x256xf32>
    %c41 = arith.constant 41 : index
    %c0_106 = arith.constant 0 : index
    %c0_107 = arith.constant 0 : index
    %258 = vector.load %arg6[%c41, %c0_106, %c0_107] : memref<49x2x256xf32, #tpu.memory_space<vmem>>, vector<1x2x256xf32>
    %259 = vector.shape_cast %258 : vector<1x2x256xf32> to vector<2x256xf32>
    %260 = arith.mulf %257, %259 : vector<2x256xf32>
    %261 = arith.addf %256, %260 : vector<2x256xf32>
    %c211_i32 = arith.constant 211 : i32
    %262 = tpu.dynamic_rotate %51 by %c211_i32 dim 1 : vector<2x256xf32>, i32 -> vector<2x256xf32>
    %c42 = arith.constant 42 : index
    %c0_108 = arith.constant 0 : index
    %c0_109 = arith.constant 0 : index
    %263 = vector.load %arg6[%c42, %c0_108, %c0_109] : memref<49x2x256xf32, #tpu.memory_space<vmem>>, vector<1x2x256xf32>
    %264 = vector.shape_cast %263 : vector<1x2x256xf32> to vector<2x256xf32>
    %265 = arith.mulf %262, %264 : vector<2x256xf32>
    %266 = arith.addf %261, %265 : vector<2x256xf32>
    %c210_i32 = arith.constant 210 : i32
    %267 = tpu.dynamic_rotate %51 by %c210_i32 dim 1 : vector<2x256xf32>, i32 -> vector<2x256xf32>
    %c43 = arith.constant 43 : index
    %c0_110 = arith.constant 0 : index
    %c0_111 = arith.constant 0 : index
    %268 = vector.load %arg6[%c43, %c0_110, %c0_111] : memref<49x2x256xf32, #tpu.memory_space<vmem>>, vector<1x2x256xf32>
    %269 = vector.shape_cast %268 : vector<1x2x256xf32> to vector<2x256xf32>
    %270 = arith.mulf %267, %269 : vector<2x256xf32>
    %271 = arith.addf %266, %270 : vector<2x256xf32>
    %c209_i32 = arith.constant 209 : i32
    %272 = tpu.dynamic_rotate %51 by %c209_i32 dim 1 : vector<2x256xf32>, i32 -> vector<2x256xf32>
    %c44 = arith.constant 44 : index
    %c0_112 = arith.constant 0 : index
    %c0_113 = arith.constant 0 : index
    %273 = vector.load %arg6[%c44, %c0_112, %c0_113] : memref<49x2x256xf32, #tpu.memory_space<vmem>>, vector<1x2x256xf32>
    %274 = vector.shape_cast %273 : vector<1x2x256xf32> to vector<2x256xf32>
    %275 = arith.mulf %272, %274 : vector<2x256xf32>
    %276 = arith.addf %271, %275 : vector<2x256xf32>
    %c208_i32 = arith.constant 208 : i32
    %277 = tpu.dynamic_rotate %51 by %c208_i32 dim 1 : vector<2x256xf32>, i32 -> vector<2x256xf32>
    %c45 = arith.constant 45 : index
    %c0_114 = arith.constant 0 : index
    %c0_115 = arith.constant 0 : index
    %278 = vector.load %arg6[%c45, %c0_114, %c0_115] : memref<49x2x256xf32, #tpu.memory_space<vmem>>, vector<1x2x256xf32>
    %279 = vector.shape_cast %278 : vector<1x2x256xf32> to vector<2x256xf32>
    %280 = arith.mulf %277, %279 : vector<2x256xf32>
    %281 = arith.addf %276, %280 : vector<2x256xf32>
    %c207_i32 = arith.constant 207 : i32
    %282 = tpu.dynamic_rotate %51 by %c207_i32 dim 1 : vector<2x256xf32>, i32 -> vector<2x256xf32>
    %c46 = arith.constant 46 : index
    %c0_116 = arith.constant 0 : index
    %c0_117 = arith.constant 0 : index
    %283 = vector.load %arg6[%c46, %c0_116, %c0_117] : memref<49x2x256xf32, #tpu.memory_space<vmem>>, vector<1x2x256xf32>
    %284 = vector.shape_cast %283 : vector<1x2x256xf32> to vector<2x256xf32>
    %285 = arith.mulf %282, %284 : vector<2x256xf32>
    %286 = arith.addf %281, %285 : vector<2x256xf32>
    %c206_i32 = arith.constant 206 : i32
    %287 = tpu.dynamic_rotate %51 by %c206_i32 dim 1 : vector<2x256xf32>, i32 -> vector<2x256xf32>
    %c47 = arith.constant 47 : index
    %c0_118 = arith.constant 0 : index
    %c0_119 = arith.constant 0 : index
    %288 = vector.load %arg6[%c47, %c0_118, %c0_119] : memref<49x2x256xf32, #tpu.memory_space<vmem>>, vector<1x2x256xf32>
    %289 = vector.shape_cast %288 : vector<1x2x256xf32> to vector<2x256xf32>
    %290 = arith.mulf %287, %289 : vector<2x256xf32>
    %291 = arith.addf %286, %290 : vector<2x256xf32>
    %c205_i32 = arith.constant 205 : i32
    %292 = tpu.dynamic_rotate %51 by %c205_i32 dim 1 : vector<2x256xf32>, i32 -> vector<2x256xf32>
    %c48 = arith.constant 48 : index
    %c0_120 = arith.constant 0 : index
    %c0_121 = arith.constant 0 : index
    %293 = vector.load %arg6[%c48, %c0_120, %c0_121] : memref<49x2x256xf32, #tpu.memory_space<vmem>>, vector<1x2x256xf32>
    %294 = vector.shape_cast %293 : vector<1x2x256xf32> to vector<2x256xf32>
    %295 = arith.mulf %292, %294 : vector<2x256xf32>
    %296 = arith.addf %291, %295 : vector<2x256xf32>
    %cst_122 = arith.constant dense<0.000000e+00> : vector<256xf32>
    %297 = vector.multi_reduction <add>, %296, %cst_122 [0] : vector<2x256xf32> to vector<256xf32>
    %298 = vector.shape_cast %297 : vector<256xf32> to vector<1x256xf32>
    %299 = vector.broadcast %4 : f32 to vector<1x256xf32>
    %300 = arith.addf %298, %299 : vector<1x256xf32>
    %301 = arith.negf %300 : vector<1x256xf32>
    %302 = math.exp %301 : vector<1x256xf32>
    %cst_123 = arith.constant 1.000000e+00 : f32
    %303 = vector.broadcast %cst_123 : f32 to vector<1x256xf32>
    %304 = arith.addf %303, %302 : vector<1x256xf32>
    %305 = arith.divf %303, %304 : vector<1x256xf32>
    %306 = vector.broadcast %305 : vector<1x256xf32> to vector<32x256xf32>
    %307 = arith.mulf %38, %306 : vector<32x256xf32>
    %c0_124 = arith.constant 0 : index
    %c0_125 = arith.constant 0 : index
    %c0_126 = arith.constant 0 : index
    %308 = vector.load %arg8[%c0_124, %c0_125, %c0_126] : memref<1x32x256xf32, #tpu.memory_space<vmem>>, vector<1x32x256xf32>
    %309 = vector.shape_cast %308 : vector<1x32x256xf32> to vector<32x256xf32>
    %310 = vector.shape_cast %307 : vector<32x256xf32> to vector<1x32x256xf32>
    tpu.vector_store %arg8[%c0_124, %c0_125, %c0_126], %310 {strides = array<i32>} : memref<1x32x256xf32, #tpu.memory_space<vmem>>, vector<1x32x256xf32>,
    return
  }
  func.func @transform_0(%arg0: i32) -> (i32, i32, i32) {
    %c0_i32 = arith.constant 0 : i32
    %c0_i32_0 = arith.constant 0 : i32
    %c0_i32_1 = arith.constant 0 : i32
    return %arg0, %c0_i32, %c0_i32_0 : i32, i32, i32
  }
  func.func @transform_1(%arg0: i32) -> (i32, i32) {
    %c0_i32 = arith.constant 0 : i32
    %c0_i32_0 = arith.constant 0 : i32
    %c0_i32_1 = arith.constant 0 : i32
    return %c0_i32, %c0_i32_0 : i32, i32
  }
  func.func @transform_2(%arg0: i32) -> (i32, i32) {
    %c0_i32 = arith.constant 0 : i32
    %c0_i32_0 = arith.constant 0 : i32
    %c0_i32_1 = arith.constant 0 : i32
    return %c0_i32, %c0_i32_0 : i32, i32
  }
  func.func @transform_3(%arg0: i32) -> (i32, i32) {
    %c0_i32 = arith.constant 0 : i32
    %c0_i32_0 = arith.constant 0 : i32
    %c0_i32_1 = arith.constant 0 : i32
    return %c0_i32, %c0_i32_0 : i32, i32
  }
  func.func @transform_4(%arg0: i32) -> (i32, i32) {
    %c0_i32 = arith.constant 0 : i32
    %c0_i32_0 = arith.constant 0 : i32
    %c0_i32_1 = arith.constant 0 : i32
    return %c0_i32, %c0_i32_0 : i32, i32
  }
  func.func @transform_5(%arg0: i32) -> (i32, i32, i32) {
    %c0_i32 = arith.constant 0 : i32
    %c0_i32_0 = arith.constant 0 : i32
    %c0_i32_1 = arith.constant 0 : i32
    %c0_i32_2 = arith.constant 0 : i32
    return %c0_i32, %c0_i32_0, %c0_i32_1 : i32, i32, i32
  }
  func.func @transform_6(%arg0: i32) -> i32 {
    %c0_i32 = arith.constant 0 : i32
    %c0_i32_0 = arith.constant 0 : i32
    return %c0_i32 : i32
  }
  func.func @transform_7(%arg0: i32) -> (i32, i32, i32) {
    %c0_i32 = arith.constant 0 : i32
    %c0_i32_0 = arith.constant 0 : i32
    %c0_i32_1 = arith.constant 0 : i32
    return %arg0, %c0_i32, %c0_i32_0 : i32, i32, i32
  }
}

</mosaic_0001>

<bundles_post_ra>
// kernel: tpu_custom_call.1
= control target key start
LH: loop header
LB: loop body
LE: loop exit
PB: predicated region body
PF: predicated region fallthrough
CT: control target
= control target key end

     0   :  { %s3217_s0 = inlined_call_operand.hbm [shape: f32[2,32,256], index: 0, kind: input, shape index: {}]   ;;  %s3218_s1 = inlined_call_operand.vmem [shape: f32[8,32], index: 1, kind: input, shape index: {}]   ;;  %s3219_s2 = inlined_call_operand.vmem [shape: f32[8,1], index: 2, kind: input, shape index: {}]   ;;  %s3220_s3 = inlined_call_operand.vmem [shape: f32[32,8], index: 3, kind: input, shape index: {}]   ;;  %s3221_s4 = inlined_call_operand.vmem [shape: f32[32,1], index: 4, kind: input, shape index: {}]   ;;  %s3222_s5 = inlined_call_operand.hbm [shape: f32[49,2,256], index: 5, kind: input, shape index: {}]   ;;  %s3223_s6 = inlined_call_operand.<no memory space> [shape: f32[1], index: 6, kind: input, shape index: {}]   ;;  %s3224_s7 = inlined_call_operand.hbm [shape: f32[2,32,256], index: 7, kind: output, shape index: {}]  }
   0x1   :  { %12 = sst [smem:[#allocation2]] %s3223_s6 }
   0x2   :  { %13 = vsyncpa [#allocation4], 0 }
   0x3   :  { %15 = vsyncpa [#allocation4 + $0x1], 0 }
   0x4   :  { %16 = vsyncpa [#allocation7], 0 }
   0x5   :  { %17 = vsyncpa [#allocation5], 0 }
   0x6   :  { %19 = vsyncpa [#allocation5 + $0x1], 0  ;;  %s2452_s26 = smov 0   ;;  %s2454_s27 = smov 0  }
   0x7   :  { %s2456_s28 = smov 0   ;;  %s2458_s29 = smov 0  }
   0x8 LB: > { %s2473_s6 = sadd.s32 4294967295, %s2347_s29   ;;  %s1966_s30 = sadd.s32 4294967294, %s2347_s29   ;;  %s2347_s29 = sphi %s2458_s29, %s3256_s29   ;;  %s2343_s28 = sphi %s2456_s28, %s3255_s28   ;;  %s2339_s27 = sphi %s2454_s27, %s3254_s27   ;;  %s2335_s26 = sphi %s2452_s26, %s3253_s26  }
   0x9   : > { %p45_p0 = scmp.ne.s32.totalorder %s2339_s27, %s2335_s26  ;;  %p3225_p1 = scmp.eq.s32.totalorder %s2473_s6, 0 }
   0xa   : > { %p201_p3 = scmp.eq.s32.totalorder %s1966_s30, 1  ;;  %p1967_p5 = scmp.ge.s32.totalorder %s2347_s29, 1 }
   0xb   : > { %p2482_p4 = por %p3225_p1, %p45_p0  ;;  %p208_p7 = scmp.lt.s32.totalorder %s2347_s29, 3 }
   0xc   : > { %p2487_p6 = por %p201_p3, %p45_p0  ;;  %s2349_s11 = smov [#allocation6]  }
   0xd   : > { %s3232_s8 = scalar_select %p2482_p4, 1, 0 }
   0xe   : > { %s3233_s9 = scalar_select %p2487_p6, 1, 0 }
   0xf   : > { %p2492_p8 = pnand %p1967_p5, %p208_p7  ;;  %s232_s12 = sshll.u32 %s2349_s11, 4  ;;  %s2496_s12 = int_to_ptr.vmem [resolvable:$true] %s232_s12 }
  0x10   : > { %s2508_s14 = sadd.s32 1, %s2347_s29   ;;  %s32_s15 = sadd.s32 1, %s2343_s28 }
  0x11   : > { %s3234_s10 = scalar_select %p2492_p8, 1, 0 }
  0x12   : > { %p2087_p9 = pneg %p2492_p8  ;;  %s29_s16 = ssub.s32 %s2347_s29, %s2508_s14 }
  0x13   : > { %s2219_s19 = scalar_lea.hbm %s3222_s5, 3136 }
  0x14   : > { %p2503_p11 = pnand %p2087_p9, %p3225_p1  ;;  %p2220_p12 = scmp.ne.s32.totalorder %s3222_s5, %s2219_s19 }
  0x15   : > { %p2226_p5 = scmp.lt.u32.totalorder %s2219_s19, %s3222_s5 }
  0x16   : > { %p2221_p13 = pneg %p2503_p11 }
  0x18   : > { %p2222_p0 = pnand %p2221_p13, %p2220_p12 }
  0x1a   : > { %p2223_p3 = pneg %p2222_p0 }
  0x1c   : > { %p2228_p7 = pnand %p2226_p5, %p2223_p3 }
  0x1e   : > { %2231 = shalt.err (!%p2228_p7)
}
  0x1f   : > { %s2232_s24 = scalar_lea.vmem %s2496_s12, 3136  ;;  %p2240_p2 = scmp.lt.s32.totalorder %s2496_s12, %s2496_s12 }
  0x20   : > { %p2233_p9 = scmp.ne.s32.totalorder %s2496_s12, %s2232_s24  ;;  %p2241_p6 = scmp.lt.s32.totalorder %s2232_s24, %s2232_s24 }
  0x22   : > { %p2235_p10 = pnand %p2233_p9, %p2221_p13  ;;  %p2242_p4 = por %p2241_p6, %p2240_p2 }
  0x24   : > { %p2236_p1 = pneg %p2235_p10 }
  0x26   : > { %p2243_p8 = pnand %p2242_p4, %p2236_p1 }
  0x28   : > { %2246 = shalt.err (!%p2243_p8)
}
  0x29   : > { %s2350_s25 = smov 64   ;;  %s2351_s30 = smov 4  }
  0x2a   : > { %2090 = dma.hbm_to_vmem [thread:$0]  (!%p2503_p11), %s3222_s5, 3136, %s2496_s12, [#allocation7], %s2350_s25, %s2350_s25, %s2351_s30  }
  0x2b   : > { %p30_p2 = scmp.eq.s32.totalorder %s29_s16, 0  ;;  %p39_p1 = scmp.ne.s32.totalorder %s2343_s28, %s2339_s27 }
  0x2c   : > { %p40_p4 = scmp.eq.s32.totalorder %s2347_s29, 0  ;;  %p2100_p6 = scmp.lt.s32.totalorder %s2347_s29, 2 }
  0x2d   : > { %s2539_s18 = scalar_select %p30_p2, %s2343_s28, %s32_s15  }
  0x2e   : > { %p41_p8 = por %p40_p4, %p39_p1  ;;  %p3236_p10 = scmp.eq.s32.totalorder %s2473_s6, 1 }
  0x2f   : > { %s249_s20 = sand.u32 1, %s2343_s28   ;;  %s2042_s21 = sshll.u32 %s2347_s29, 10 }
  0x30   : > { %p2543_p12 = por %p3236_p10, %p39_p1  ;;  %s1970_s22 = sshll.u32 %s249_s20, 6 }
  0x31   : > { %s2552_s24 = scalar_lea.hbm %s3217_s0, %s2042_s21  ;;  %s253_s12 = scalar_lea.vmem [#allocation3], %s1970_s22 }
  0x32   : > { %s260_s15 = sshll.u32 %s253_s12, 4  ;;  %p2554_p11 = pnand %p2100_p6, %p41_p8  ;;  %s2558_s15 = int_to_ptr.vmem [resolvable:$true] %s260_s15 }
  0x33   : > { %s2560_s25 = scalar_lea.sflag [#allocation4], %s249_s20  ;;  %s2247_s30 = scalar_lea.hbm %s2552_s24, 1024 }
  0x34   : > { %p2248_p13 = scmp.ne.s32.totalorder %s2552_s24, %s2247_s30  ;;  %p2249_p0 = pneg %p2554_p11 }
  0x35   : > { %s2252_s21 = scalar_lea.hbm %s3217_s0, 2048  ;;  %p2253_p7 = scmp.lt.u32.totalorder %s2552_s24, %s3217_s0 }
  0x36   : > { %p2250_p3 = pnand %p2249_p0, %p2248_p13  ;;  %p2254_p9 = scmp.lt.u32.totalorder %s2252_s21, %s2247_s30 }
  0x37   : > { %p2256_p1 = scmp.lt.u32.totalorder %s2247_s30, %s2552_s24 }
  0x38   : > { %p2251_p5 = pneg %p2250_p3  ;;  %p2255_p2 = por %p2254_p9, %p2253_p7 }
  0x3a   : > { %p2257_p4 = por %p2256_p1, %p2255_p2 }
  0x3c   : > { %p2258_p6 = pnand %p2257_p4, %p2251_p5 }
  0x3e   : > { %2261 = shalt.err (!%p2258_p6)
}
  0x3f   : > { %s2262_s20 = scalar_lea.vmem %s2558_s15, 1024  ;;  %s2352_s23 = smov [#allocation3]  }
  0x40   : > { %p2263_p8 = scmp.ne.s32.totalorder %s2558_s15, %s2262_s20  ;;  %s2267_s12 = sshll.u32 %s2352_s23, 4  ;;  %s2268_s12 = int_to_ptr.vmem [resolvable:$false] %s2267_s12 }
  0x41   : > { %s2269_s11 = scalar_lea.vmem %s2268_s12, 2048  ;;  %p2270_p3 = scmp.lt.s32.totalorder %s2558_s15, %s2268_s12 }
  0x42   : > { %p2265_p10 = pnand %p2263_p8, %p2249_p0  ;;  %p2271_p7 = scmp.lt.s32.totalorder %s2269_s11, %s2262_s20 }
  0x44   : > { %p2266_p13 = pneg %p2265_p10  ;;  %p2272_p9 = por %p2271_p7, %p2270_p3 }
  0x46   : > { %p2273_p2 = pnand %p2272_p9, %p2266_p13 }
  0x48   : > { %2276 = shalt.err (!%p2273_p2)
}
  0x49   : > { %s2353_s30 = smov 256   ;;  %s2354_s17 = smov 16  }
  0x4a   : > { %2094 = dma.hbm_to_vmem [thread:$0]  (!%p2554_p11), %s2552_s24, 1024, %s2558_s15, %s2560_s25, %s2353_s30, %s2353_s30, %s2354_s17  }
  0x4b   : > { %p3239_p0 = scmp.ne.s32.totalorder %s3234_s10, 0 }
  0x4d   : > { %272 = sbr.rel (%p3239_p0) target bundleno = 1258 (0x4ea), region = 48 }
  0x54   : > { %s2591_s21 = sand.u32 1, %s2339_s27   ;;  %p3240_p5 = scmp.ne.s32.totalorder %s3232_s8, 0 }
  0x55   : > { %s1974_s22 = sshll.u32 %s2591_s21, 6  ;;  %s275_s13 = scalar_lea.sflag [#allocation4], %s2591_s21 }
  0x56   : > { %s278_s20 = scalar_lea.vmem [#allocation3], %s1974_s22 }
  0x57   : > { %2322 = dma.done.wait (%p3240_p5), %s275_s13, 1024  }
  0x58   : > { %2324 = vsyncadd (%p3240_p5), %s275_s13, 4294966272  ;;  %p3241_p11 = scmp.eq.s32.totalorder %s2473_s6, 0 }
  0x5a   : > { %2326 = dma.done.wait (%p3241_p11), [#allocation7], 3136   ;;  %p3242_p1 = pmov %p3241_p11 }
  0x5b   : > { %v2605_v0 = vld [vmem:[%s278_s20] sm:$0xff]  ;;  %v2607_v1 = vld [vmem:[%s278_s20 + $0x8] sm:$0xff]  ;;  %v2609_v2 = vld [vmem:[%s278_s20 + $0x10] sm:$0xff]  ;;  %v2355_v16 = vmov 0.0|0.0   ;;  %vm2356_vm0 = vmmov 0   ;;  %v2357_v17 = vmov 0.0   ;;  %v324_v20 = vlaneseq }
  0x5c   : > { %2328 = vsyncadd (%p3242_p1), [#allocation7], 4294964160  ;;  %v353_v3 = vmax.f32 %v2605_v0, %v2607_v1  ;;  %v336_v4 = vadd.f32 %v2607_v1, %v2605_v0  ;;  %v2615_v5 = vld [vmem:[%s278_s20 + $0x18] sm:$0xff]  ;;  %v2621_v8 = vld [vmem:[%s278_s20 + $0x30] sm:$0xff]  ;;  %2073 = vmatprep.subr.bf16.mxu0 %v2355_v16  ;;  %2062 = vmatprep.mubr.msk.f32.mxu0 %vm2356_vm0, %v2357_v17  ;;  %v2358_v19 = vmov 0   ;;  %vm375_vm2 = vcmask 261120  }
  0x5d   : > { %v356_v6 = vmax.f32 %v2609_v2, %v2615_v5  ;;  %v339_v7 = vadd.f32 %v2615_v5, %v2609_v2  ;;  %v2623_v9 = vld [vmem:[%s278_s20 + $0x38] sm:$0xff]  ;;  %v2625_v10 = vld [vmem:[%s278_s20 + $0x20] sm:$0xff]  ;;  %v2627_v11 = vld [vmem:[%s278_s20 + $0x28] sm:$0xff]  ;;  %2193 = vset.pattern.permute.xlu0 %v2358_v19  ;;  %2194 = vset.pattern.permute.xlu1 %v2358_v19  ;;  %v2641_v23 = vand.u32 127, %v324_v20  ;;  %vm470_vm3 = vcmask 64512   ;;  %s2359_s12 = smov 51  }
  0x5e   : > { %354 = vmax.xlane.f32.xlu1 %v353_v3  ;;  %337 = vadd.xlane.f32.xlu0 %v336_v4  ;;  %v345_v12 = vadd.f32 %v2623_v9, %v2621_v8  ;;  %v342_v13 = vadd.f32 %v2627_v11, %v2625_v10  ;;  %v362_v14 = vmax.f32 %v2621_v8, %v2623_v9  ;;  %v314_v18 = vld [vmem:[%s3219_s2] sm:$0xff]  ;;  %v320_v43 = vld [vmem:[%s3221_s4 + $0x8] sm:$0xff]  ;;  %v321_v44 = vld [vmem:[%s3221_s4 + $0x10] sm:$0xff]  ;;  %vm568_vm4 = vcmask 15360   ;;  %s2360_s11 = smov 49   ;;  %s2361_s30 = smov 50  }
  0x5f   : > { %v359_v15 = vmax.f32 %v2625_v10, %v2627_v11  ;;  %vm365_vm1 = vcmp.eq.s32.totalorder %v2641_v23, 0  ;;  %v313_v40 = vld [vmem:[%s3218_s1] sm:$0xff]  ;;  %v322_v45 = vld [vmem:[%s3221_s4 + $0x18] sm:$0xff]  ;;  %v316_v51 = vld [vmem:[%s3220_s3 + $0x8] sm:$0xff]  ;;  %s2362_s17 = smov 48   ;;  %s2363_s13 = smov 47  }
  0x60   : > { %v315_v41 = vld [vmem:[%s3220_s3] sm:$0xff]  ;;  %v317_v52 = vld [vmem:[%s3220_s3 + $0x10] sm:$0xff]  ;;  %v318_v53 = vld [vmem:[%s3220_s3 + $0x18] sm:$0xff]  ;;  %s2364_s20 = smov 46   ;;  %s2365_s8 = smov 45   ;;  %vm659_vm6 = vcmp.lt.s32.totalorder %v2641_v23, 51 }
  0x61   : > { %2067 = vmatprep.mubr.msk.f32.mxu1 %vm470_vm3, %v315_v41  ;;  %v319_v42 = vld [vmem:[%s3221_s4] sm:$0xff]  ;;  %s2366_s10 = smov 35   ;;  %s2367_s24 = smov 34   ;;  %vm682_vm7 = vcmp.lt.s32.totalorder %v2641_v23, 50  ;;  %vm706_vm8 = vcmp.lt.s32.totalorder %v2641_v23, 49  ;;  %vm730_vm9 = vcmp.lt.s32.totalorder %v2641_v23, 48 }
  0x62   : > { %357 = vmax.xlane.f32.xlu1 %v356_v6  ;;  %340 = vadd.xlane.f32.xlu0 %v339_v7  ;;  %s2368_s15 = smov 33   ;;  %s2369_s16 = smov 32   ;;  %vm754_vm10 = vcmp.lt.s32.totalorder %v2641_v23, 47  ;;  %vm778_vm11 = vcmp.lt.s32.totalorder %v2641_v23, 46  ;;  %vm802_vm12 = vcmp.lt.s32.totalorder %v2641_v23, 45  ;;  %vm826_vm13 = vcmp.lt.s32.totalorder %v2641_v23, 35 }
  0x63   : > { %s2370_s25 = smov 31   ;;  %s2371_s23 = smov 30   ;;  %vm850_vm14 = vcmp.lt.s32.totalorder %v2641_v23, 34  ;;  %vm874_vm15 = vcmp.lt.s32.totalorder %v2641_v23, 33  ;;  %vm898_vm0 = vcmp.lt.s32.totalorder %v2641_v23, 32 }
  0x66   : > { %346 = vadd.xlane.f32.xlu1 %v345_v12  ;;  %343 = vadd.xlane.f32.xlu0 %v342_v13 }
  0x6a   : > { %363 = vmax.xlane.f32.xlu1 %v362_v14  ;;  %360 = vmax.xlane.f32.xlu0 %v359_v15 }
  0x7b   : > { %452 = vperm.xlu1 %2194, %v319_v42  }
  0x7f   : > { %457 = vperm.xlu1 %2194, %v320_v43  }
  0x80   : > { %372 = vperm.xlu0 %2193, %v314_v18  }
  0x83   : > { %462 = vperm.xlu1 %2194, %v321_v44  }
  0x87   : > { %467 = vperm.xlu1 %2194, %v322_v45  }
  0xeb   : > { %v355_v21 = vpop.xlane.xlu1 %354  ;;  %v338_v22 = vpop.xlane.xlu0 %337 }
  0xec   : > { %v349_v24 = vmul.f32 0.00390625, %v338_v22 }
  0xee   : > { %v366_v28 = vsel %vm365_vm1, %v349_v24, %v355_v21 }
  0xef   : > { %v358_v25 = vpop.xlane.xlu1 %357  ;;  %v341_v26 = vpop.xlane.xlu0 %340 }
  0xf0   : > { %v350_v27 = vmul.f32 0.00390625, %v341_v26 }
  0xf2   : > { %v367_v29 = vsel %vm365_vm1, %v350_v27, %v358_v25 }
  0xf3   : > { %v347_v30 = vpop.xlane.xlu1 %346  ;;  %v344_v31 = vpop.xlane.xlu0 %343  ;;  %v2074_v32 = vpack.c.bf16 %v367_v29, %v366_v28 }
  0xf4   : > { %v352_v33 = vmul.f32 0.00390625, %v347_v30  ;;  %v351_v34 = vmul.f32 0.00390625, %v344_v31 }
  0xf5   : > { %2075 = vmatpush3.bf16.msra.mxu0 %v2074_v32 }
  0xf6   : > { %2076 = vmatprep.subr.bf16.mxu0 %v2355_v16 }
  0xf7   : > { %v364_v35 = vpop.xlane.xlu1 %363  ;;  %v361_v36 = vpop.xlane.xlu0 %360 }
  0xf8   : > { %v369_v37 = vsel %vm365_vm1, %v352_v33, %v364_v35  ;;  %v368_v38 = vsel %vm365_vm1, %v351_v34, %v361_v36  ;;  %vm922_vm1 = vcmp.lt.s32.totalorder %v2641_v23, 31 }
  0xf9   : > { %v2077_v39 = vpack.c.bf16 %v369_v37, %v368_v38 }
  0xfb   : > { %2078 = vmatpush3.bf16.msra.mxu0 %v2077_v39  ;;  %v453_v54 = vpop.permute.xlu1 %452 }
  0xfe   : > { %2063 = vmatmul.mubr.msk.f32.vlgmr.msra.gmra.mrb[0].mxu0 %vm375_vm2, %v313_v40  ;;  %vm946_vm2 = vcmp.lt.s32.totalorder %v2641_v23, 30 }
  0xff   : > { %v373_v46 = vpop.permute.xlu0 %372  ;;  %v458_v55 = vpop.permute.xlu1 %457 }
 0x103   : > { %v463_v56 = vpop.permute.xlu1 %462 }
 0x107   : > { %v468_v62 = vpop.permute.xlu1 %467 }
 0x1d1   : > { %v445_v47 = vpop.f32.mrb[0].mxu0 }
 0x1d2   : > { %v446_v48 = vadd.f32 %v445_v47, %v373_v46  ;;  %v2064_v49 = vpop.f32.mrb[1].mxu0 }
 0x1d4   : > { %v449_v50 = vmax.f32 %v446_v48, 0.0 }
 0x1d6   : > { %2065 = vmatprep.subr.mxu1 %v449_v50 }
 0x1d7   : > { %2066 = vmatpush3.msra.mxu1 %v449_v50 }
 0x1d8   : > { %2068 = vmatmul.mubr.msk.f32.vlgmr.msra.gmra.mrb[0].mxu1 %vm470_vm3, %v316_v51 }
 0x1d9   : > { %2070 = vmatprep.mubr.msk.f32.mxu1 %vm470_vm3, %v317_v52 }
 0x1dc   : > { %2071 = vmatmul.mubr.msk.f32.gmra.mrb[2].mxu1 %vm470_vm3, %v318_v53  ;;  %vm970_vm3 = vcmp.lt.s32.totalorder %v2641_v23, 29 }
 0x2ab   : > { %v2069_v57 = vpop.f32.mrb[0].mxu1 }
 0x2ac   : > { %v555_v58 = vadd.f32 %v2069_v57, %v458_v55  ;;  %v549_v59 = vpop.f32.mrb[1].mxu1 }
 0x2ad   : > { %v550_v60 = vadd.f32 %v549_v59, %v453_v54 }
 0x2ae   : > { %v572_v61 = vsel %vm568_vm4, %v555_v58, 0.0 }
 0x2af   : > { %573 = vadd.xlane.f32.xlu0 %v572_v61  ;;  %v2072_v63 = vpop.f32.mrb[2].mxu1  ;;  %v569_v3 = vsel %vm568_vm4, %v550_v60, 0.0 }
 0x2b0   : > { %v565_v4 = vadd.f32 %v2072_v63, %v468_v62  ;;  %v559_v6 = vpop.f32.mrb[3].mxu1  ;;  %570 = vadd.xlane.f32.xlu1 %v569_v3  ;;  %v327_v3 = vshrl.u32 %v324_v20, 7 }
 0x2b1   : > { %v560_v12 = vadd.f32 %v559_v6, %v463_v56 }
 0x2b2   : > { %v578_v7 = vsel %vm568_vm4, %v565_v4, 0.0  ;;  %vm652_vm5 = vcmp.eq.s32.totalorder %v327_v3, 0 }
 0x2b3   : > { %v575_v13 = vsel %vm568_vm4, %v560_v12, 0.0  ;;  %vm994_vm4 = vcmp.lt.s32.totalorder %v2641_v23, 19 }
 0x2b4   : > { %579 = vadd.xlane.f32.xlu1 %v578_v7 }
 0x2b8   : > { %576 = vadd.xlane.f32.xlu1 %v575_v13 }
 0x33c   : > { %v574_v14 = vpop.xlane.xlu0 %573 }
 0x33d   : > { %v1983_v15 = vmul.f32 -1.442695, %v574_v14  ;;  %v571_v16 = vpop.xlane.xlu1 %570 }
 0x33e   : > { %v1982_v17 = vmul.f32 -1.442695, %v571_v16 }
 0x33f   : > { %2195 = vpow2.f32 %v1983_v15 }
 0x340   : > { %2197 = vpow2.f32 %v1982_v17 }
 0x341   : > { %v580_v18 = vpop.xlane.xlu1 %579 }
 0x342   : > { %v1985_v19 = vmul.f32 -1.442695, %v580_v18 }
 0x344   : > { %2199 = vpow2.f32 %v1985_v19 }
 0x345   : > { %v577_v21 = vpop.xlane.xlu1 %576 }
 0x346   : > { %v1984_v22 = vmul.f32 -1.442695, %v577_v21 }
 0x348   : > { %2201 = vpow2.f32 %v1984_v22 }
 0x349   : > { %v2196_v24 = vpop.eup %2195 }
 0x34a   : > { %v2198_v25 = vpop.eup %2197  ;;  %v594_v26 = vadd.f32 1.0, %v2196_v24 }
 0x34b   : > { %v593_v27 = vadd.f32 1.0, %v2198_v25 }
 0x34c   : > { %2203 = vrcp.f32 %v594_v26  ;;  %v1986_v26 = vld.sshfl [vmem:[#allocation6] sm:$0x33 pattern:$0x76325410] }
 0x34d   : > { %2205 = vrcp.f32 %v593_v27  ;;  %v1987_v27 = vld.sshfl [vmem:[#allocation6 + $0x4] sm:$0x33 pattern:$0x76325410] }
 0x34e   : > { %v2200_v28 = vpop.eup %2199 }
 0x34f   : > { %v596_v29 = vadd.f32 1.0, %v2200_v28 }
 0x351   : > { %2207 = vrcp.f32 %v596_v29 }
 0x352   : > { %v2202_v30 = vpop.eup %2201 }
 0x353   : > { %v595_v31 = vadd.f32 1.0, %v2202_v30  ;;  %v671_v30 = vcombine.high %v1986_v26, %v1986_v26 }
 0x355   : > { %2209 = vrcp.f32 %v595_v31  ;;  %v695_v31 = vcombine.high %v1987_v27, %v1987_v27 }
 0x356   : > { %v2204_v32 = vpop.eup %2203 }
 0x357   : > { %v2206_v33 = vpop.eup %2205  ;;  %v2676_v35 = vmul.f32 %v2204_v32, %v2609_v2  ;;  %v2679_v36 = vmul.f32 %v2204_v32, %v2615_v5  ;;  %v1988_v32 = vld.sshfl [vmem:[#allocation6 + $0x8] sm:$0x33 pattern:$0x76325410] }
 0x358   : > { %v2682_v37 = vmul.f32 %v2206_v33, %v2605_v0  ;;  %v2685_v38 = vmul.f32 %v2206_v33, %v2607_v1 }
 0x359   : > { %3243 = vst [vmem:[#allocation12_spill] sm:$0xff] %v2679_v36 }
 0x35a   : > { %3244 = vst [vmem:[#allocation13_spill] sm:$0xff] %v2685_v38  ;;  %v613_v2 = vadd.f32 %v2676_v35, %v2682_v37  ;;  %v622_v5 = vadd.f32 %v2679_v36, %v2685_v38 }
 0x35b   : > { %v2208_v34 = vpop.eup %2207 }
 0x35c   : > { %v2688_v39 = vmul.f32 %v2208_v34, %v2621_v8  ;;  %v2691_v40 = vmul.f32 %v2208_v34, %v2623_v9 }
 0x35e   : > { %3245 = vst [vmem:[#allocation14_spill] sm:$0xff] %v2691_v40  ;;  %v635_v1 = vmax.f32 %v2676_v35, %v2688_v39  ;;  %v644_v8 = vmax.f32 %v2679_v36, %v2691_v40  ;;  %v2008_v36 = vld.sshfl [vmem:[#allocation6 + $0x58] sm:$0x33 pattern:$0x76325410] }
 0x35f   : > { %v2210_v41 = vpop.eup %2209 }
 0x360   : > { %v2698_v42 = vmul.f32 %v2210_v41, %v2625_v10  ;;  %v2701_v0 = vmul.f32 %v2210_v41, %v2627_v11 }
 0x362   : > { %3246 = vst [vmem:[#allocation15_spill] sm:$0xff] %v2701_v0  ;;  %v614_v9 = vadd.f32 %v613_v2, %v2698_v42  ;;  %v623_v43 = vadd.f32 %v622_v5, %v2701_v0  ;;  %v634_v44 = vmax.f32 %v2682_v37, %v2698_v42  ;;  %v643_v10 = vmax.f32 %v2685_v38, %v2701_v0 }
 0x364   : > { %v615_v45 = vadd.f32 %v614_v9, %v2688_v39  ;;  %v624_v11 = vadd.f32 %v623_v43, %v2691_v40  ;;  %v636_v46 = vmax.f32 %v634_v44, %v635_v1  ;;  %v645_v47 = vmax.f32 %v643_v10, %v644_v8  ;;  %v1989_v44 = vld.sshfl [vmem:[#allocation6 + $0xc] sm:$0x33 pattern:$0x76325410] }
 0x365   : > { %v719_v1 = vcombine.high %v1988_v32, %v1988_v32 }
 0x366   : > { %v616_v48 = vrot.slane %v615_v45, 4  ;;  %v625_v49 = vrot.slane %v624_v11, 4  ;;  %v637_v50 = vrot.slane %v636_v46, 4  ;;  %v646_v51 = vrot.slane %v645_v47, 4 }
 0x368   : > { %v617_v52 = vadd.f32 %v616_v48, %v615_v45  ;;  %v626_v53 = vadd.f32 %v625_v49, %v624_v11  ;;  %v638_v54 = vmax.f32 %v636_v46, %v637_v50  ;;  %v647_v55 = vmax.f32 %v645_v47, %v646_v51 }
 0x369   : > { %v743_v51 = vcombine.high %v1989_v44, %v1989_v44 }
 0x36a   : > { %v618_v56 = vrot.slane %v617_v52, 2  ;;  %v627_v57 = vrot.slane %v626_v53, 2  ;;  %v639_v58 = vrot.slane %v638_v54, 2  ;;  %v648_v59 = vrot.slane %v647_v55, 2 }
 0x36c   : > { %v619_v60 = vadd.f32 %v618_v56, %v617_v52  ;;  %v628_v61 = vadd.f32 %v627_v57, %v626_v53  ;;  %v640_v62 = vmax.f32 %v638_v54, %v639_v58  ;;  %v649_v63 = vmax.f32 %v647_v55, %v648_v59  ;;  %v1990_v52 = vld.sshfl [vmem:[#allocation6 + $0x10] sm:$0x33 pattern:$0x76325410] }
 0x36e   : > { %v620_v4 = vrot.slane %v619_v60, 1  ;;  %v629_v6 = vrot.slane %v628_v61, 1  ;;  %v641_v7 = vrot.slane %v640_v62, 1  ;;  %v650_v12 = vrot.slane %v649_v63, 1 }
 0x370   : > { %v621_v13 = vadd.f32 %v620_v4, %v619_v60  ;;  %v630_v14 = vadd.f32 %v629_v6, %v628_v61  ;;  %v642_v17 = vmax.f32 %v640_v62, %v641_v7  ;;  %v651_v18 = vmax.f32 %v649_v63, %v650_v12  ;;  %v1991_v62 = vld.sshfl [vmem:[#allocation6 + $0x14] sm:$0x33 pattern:$0x76325410] }
 0x371   : > { %v767_v61 = vcombine.high %v1990_v52, %v1990_v52 }
 0x372   : > { %v632_v15 = vmul.f32 0.03125, %v621_v13  ;;  %v633_v16 = vmul.f32 0.03125, %v630_v14 }
 0x374   : > { %v2716_v19 = vsel %vm652_vm5, %v632_v15, %v642_v17  ;;  %v2718_v21 = vsel %vm652_vm5, %v633_v16, %v651_v18  ;;  %v791_v15 = vcombine.high %v1991_v62, %v1991_v62  ;;  %v1992_v16 = vld.sshfl [vmem:[#allocation6 + $0x18] sm:$0x33 pattern:$0x76325410]  ;;  %vm1018_vm5 = vcmp.lt.s32.totalorder %v2641_v23, 18 }
 0x375   : > { %657 = vrot.lane.b32.xlu0 %v2718_v21, %s2359_s12  ;;  %655 = vrot.lane.b32.xlu1 %v2716_v19, %s2359_s12  ;;  %s2372_s12 = smov 29  }
 0x379   : > { %702 = vrot.lane.b32.xlu0 %v2716_v19, %s2360_s11  ;;  %678 = vrot.lane.b32.xlu1 %v2716_v19, %s2361_s30 }
 0x37d   : > { %726 = vrot.lane.b32.xlu0 %v2716_v19, %s2362_s17  ;;  %680 = vrot.lane.b32.xlu1 %v2718_v21, %s2361_s30  ;;  %s2374_s30 = smov 18  }
 0x381   : > { %750 = vrot.lane.b32.xlu0 %v2716_v19, %s2363_s13  ;;  %704 = vrot.lane.b32.xlu1 %v2718_v21, %s2360_s11  ;;  %s2373_s11 = smov 19  }
 0x385   : > { %774 = vrot.lane.b32.xlu0 %v2716_v19, %s2364_s20  ;;  %728 = vrot.lane.b32.xlu1 %v2718_v21, %s2362_s17  ;;  %s2375_s17 = smov 17  }
 0x389   : > { %798 = vrot.lane.b32.xlu0 %v2716_v19, %s2365_s8  ;;  %752 = vrot.lane.b32.xlu1 %v2718_v21, %s2363_s13  ;;  %s2376_s13 = smov 16  }
 0x38d   : > { %822 = vrot.lane.b32.xlu0 %v2716_v19, %s2366_s10  ;;  %776 = vrot.lane.b32.xlu1 %v2718_v21, %s2364_s20  ;;  %s2377_s20 = smov 15  }
 0x391   : > { %846 = vrot.lane.b32.xlu0 %v2716_v19, %s2367_s24  ;;  %800 = vrot.lane.b32.xlu1 %v2718_v21, %s2365_s8  ;;  %s2378_s8 = smov 14  }
 0x395   : > { %870 = vrot.lane.b32.xlu0 %v2716_v19, %s2368_s15  ;;  %824 = vrot.lane.b32.xlu1 %v2718_v21, %s2366_s10  ;;  %s2379_s10 = smov 13  }
 0x399   : > { %894 = vrot.lane.b32.xlu0 %v2716_v19, %s2369_s16  ;;  %848 = vrot.lane.b32.xlu1 %v2718_v21, %s2367_s24  ;;  %s2380_s24 = smov 3  }
 0x39d   : > { %918 = vrot.lane.b32.xlu0 %v2716_v19, %s2370_s25  ;;  %872 = vrot.lane.b32.xlu1 %v2718_v21, %s2368_s15  ;;  %s2381_s15 = smov 2  }
 0x3a1   : > { %942 = vrot.lane.b32.xlu0 %v2716_v19, %s2371_s23  ;;  %896 = vrot.lane.b32.xlu1 %v2718_v21, %s2369_s16  ;;  %s2382_s16 = smov 1  }
 0x3a5   : > { %966 = vrot.lane.b32.xlu0 %v2716_v19, %s2372_s12  ;;  %920 = vrot.lane.b32.xlu1 %v2718_v21, %s2370_s25  ;;  %s2383_s25 = smov 127  }
 0x3a9   : > { %990 = vrot.lane.b32.xlu0 %v2716_v19, %s2373_s11  ;;  %944 = vrot.lane.b32.xlu1 %v2718_v21, %s2371_s23  ;;  %s2384_s23 = smov 126  }
 0x3ad   : > { %1014 = vrot.lane.b32.xlu0 %v2716_v19, %s2374_s30  ;;  %968 = vrot.lane.b32.xlu1 %v2718_v21, %s2372_s12  ;;  %s2385_s12 = smov 125  }
 0x3b1   : > { %1038 = vrot.lane.b32.xlu0 %v2716_v19, %s2375_s17  ;;  %992 = vrot.lane.b32.xlu1 %v2718_v21, %s2373_s11  ;;  %s2386_s11 = smov 115  }
 0x3b5   : > { %1062 = vrot.lane.b32.xlu0 %v2716_v19, %s2376_s13  ;;  %1016 = vrot.lane.b32.xlu1 %v2718_v21, %s2374_s30  ;;  %s2387_s30 = smov 114  }
 0x3b9   : > { %1086 = vrot.lane.b32.xlu0 %v2716_v19, %s2377_s20  ;;  %1040 = vrot.lane.b32.xlu1 %v2718_v21, %s2375_s17  ;;  %s2388_s17 = smov 113  }
 0x3bd   : > { %1110 = vrot.lane.b32.xlu0 %v2716_v19, %s2378_s8  ;;  %1064 = vrot.lane.b32.xlu1 %v2718_v21, %s2376_s13 }
 0x3c1   : > { %1134 = vrot.lane.b32.xlu0 %v2716_v19, %s2379_s10  ;;  %1088 = vrot.lane.b32.xlu1 %v2718_v21, %s2377_s20  ;;  %s2389_s20 = smov 112  }
 0x3c5   : > { %1158 = vrot.lane.b32.xlu0 %v2716_v19, %s2380_s24  ;;  %1112 = vrot.lane.b32.xlu1 %v2718_v21, %s2378_s8  ;;  %s2390_s8 = smov 111  }
 0x3c9   : > { %1182 = vrot.lane.b32.xlu0 %v2716_v19, %s2381_s15  ;;  %1136 = vrot.lane.b32.xlu1 %v2718_v21, %s2379_s10  ;;  %s2391_s10 = smov 110  }
 0x3cd   : > { %1206 = vrot.lane.b32.xlu0 %v2716_v19, %s2382_s16  ;;  %1160 = vrot.lane.b32.xlu1 %v2718_v21, %s2380_s24  ;;  %s2392_s24 = smov 109  }
 0x3d1   : > { %1247 = vrot.lane.b32.xlu0 %v2716_v19, %s2383_s25  ;;  %1184 = vrot.lane.b32.xlu1 %v2718_v21, %s2381_s15  ;;  %s2393_s15 = smov 99  }
 0x3d5   : > { %1271 = vrot.lane.b32.xlu0 %v2716_v19, %s2384_s23  ;;  %1208 = vrot.lane.b32.xlu1 %v2718_v21, %s2382_s16  ;;  %s2394_s16 = smov 98  }
 0x3d9   : > { %1295 = vrot.lane.b32.xlu0 %v2716_v19, %s2385_s12  ;;  %1249 = vrot.lane.b32.xlu1 %v2718_v21, %s2383_s25  ;;  %s2395_s25 = smov 97  }
 0x3dd   : > { %1319 = vrot.lane.b32.xlu0 %v2716_v19, %s2386_s11  ;;  %1273 = vrot.lane.b32.xlu1 %v2718_v21, %s2384_s23  ;;  %s2396_s23 = smov 96  }
 0x3e1   : > { %1343 = vrot.lane.b32.xlu0 %v2716_v19, %s2387_s30  ;;  %1297 = vrot.lane.b32.xlu1 %v2718_v21, %s2385_s12  ;;  %s2397_s12 = smov 95  }
 0x3e5   : > { %1367 = vrot.lane.b32.xlu0 %v2716_v19, %s2388_s17  ;;  %1321 = vrot.lane.b32.xlu1 %v2718_v21, %s2386_s11  ;;  %s2398_s11 = smov 94  }
 0x3e7   : > { %v658_v20 = vpop.permute.xlu0 %657  ;;  %v656_v22 = vpop.permute.xlu1 %655 }
 0x3e8   : > { %v660_v24 = vsel %vm659_vm6, %v656_v22, %v658_v20  ;;  %v661_v25 = vsel %vm659_vm6, %v658_v20, %v656_v22  ;;  %vm1042_vm6 = vcmp.lt.s32.totalorder %v2641_v23, 17 }
 0x3e9   : > { %1391 = vrot.lane.b32.xlu0 %v2716_v19, %s2389_s20  ;;  %1345 = vrot.lane.b32.xlu1 %v2718_v21, %s2387_s30  ;;  %v674_v41 = vmul.f32 %v1986_v26, %v661_v25  ;;  %v675_v8 = vmul.f32 %v671_v30, %v660_v24  ;;  %s2399_s30 = smov 93  }
 0x3eb   : > { %v703_v28 = vpop.permute.xlu0 %702  ;;  %v679_v29 = vpop.permute.xlu1 %678 }
 0x3ed   : > { %1415 = vrot.lane.b32.xlu0 %v2716_v19, %s2390_s8  ;;  %1369 = vrot.lane.b32.xlu1 %v2718_v21, %s2388_s17  ;;  %s2400_s17 = smov 83  }
 0x3ef   : > { %v727_v33 = vpop.permute.xlu0 %726  ;;  %v681_v34 = vpop.permute.xlu1 %680 }
 0x3f0   : > { %v683_v2 = vsel %vm682_vm7, %v679_v29, %v681_v34  ;;  %v684_v5 = vsel %vm682_vm7, %v681_v34, %v679_v29  ;;  %v1993_v29 = vld.sshfl [vmem:[#allocation6 + $0x1c] sm:$0x33 pattern:$0x76325410]  ;;  %vm1066_vm7 = vcmp.lt.s32.totalorder %v2641_v23, 16 }
 0x3f1   : > { %v698_v9 = vmul.f32 %v1987_v27, %v684_v5  ;;  %v699_v43 = vmul.f32 %v695_v31, %v683_v2  ;;  %1439 = vrot.lane.b32.xlu0 %v2716_v19, %s2391_s10  ;;  %1393 = vrot.lane.b32.xlu1 %v2718_v21, %s2389_s20  ;;  %s2401_s20 = smov 82  }
 0x3f3   : > { %v700_v10 = vadd.f32 %v698_v9, %v674_v41  ;;  %v701_v45 = vadd.f32 %v699_v43, %v675_v8  ;;  %v751_v11 = vpop.permute.xlu0 %750  ;;  %v705_v46 = vpop.permute.xlu1 %704  ;;  %v1994_v8 = vld.sshfl [vmem:[#allocation6 + $0x20] sm:$0x33 pattern:$0x76325410] }
 0x3f4   : > { %v707_v47 = vsel %vm706_vm8, %v703_v28, %v705_v46  ;;  %v708_v48 = vsel %vm706_vm8, %v705_v46, %v703_v28  ;;  %v815_v28 = vcombine.high %v1992_v16, %v1992_v16  ;;  %vm1090_vm8 = vcmp.lt.s32.totalorder %v2641_v23, 15 }
 0x3f5   : > { %v722_v49 = vmul.f32 %v1988_v32, %v708_v48  ;;  %v723_v50 = vmul.f32 %v719_v1, %v707_v47  ;;  %1463 = vrot.lane.b32.xlu0 %v2716_v19, %s2392_s24  ;;  %1417 = vrot.lane.b32.xlu1 %v2718_v21, %s2390_s8  ;;  %v839_v1 = vcombine.high %v1993_v29, %v1993_v29  ;;  %s2402_s8 = smov 81  }
 0x3f6   : > { %v863_v48 = vcombine.high %v1994_v8, %v1994_v8 }
 0x3f7   : > { %v724_v53 = vadd.f32 %v722_v49, %v700_v10  ;;  %v725_v54 = vadd.f32 %v723_v50, %v701_v45  ;;  %v775_v55 = vpop.permute.xlu0 %774  ;;  %v729_v56 = vpop.permute.xlu1 %728  ;;  %v1995_v49 = vld.sshfl [vmem:[#allocation6 + $0x24] sm:$0x33 pattern:$0x76325410] }
 0x3f8   : > { %v731_v57 = vsel %vm730_vm9, %v727_v33, %v729_v56  ;;  %v732_v58 = vsel %vm730_vm9, %v729_v56, %v727_v33  ;;  %vm1114_vm9 = vcmp.lt.s32.totalorder %v2641_v23, 14 }
 0x3f9   : > { %v746_v59 = vmul.f32 %v1989_v44, %v732_v58  ;;  %v747_v60 = vmul.f32 %v743_v51, %v731_v57  ;;  %1487 = vrot.lane.b32.xlu0 %v2716_v19, %s2393_s15  ;;  %1441 = vrot.lane.b32.xlu1 %v2718_v21, %s2391_s10  ;;  %v887_v58 = vcombine.high %v1995_v49, %v1995_v49  ;;  %s2403_s10 = smov 80  }
 0x3fb   : > { %v748_v63 = vadd.f32 %v746_v59, %v724_v53  ;;  %v749_v3 = vadd.f32 %v747_v60, %v725_v54  ;;  %v799_v4 = vpop.permute.xlu0 %798  ;;  %v753_v6 = vpop.permute.xlu1 %752  ;;  %v1996_v59 = vld.sshfl [vmem:[#allocation6 + $0x28] sm:$0x33 pattern:$0x76325410] }
 0x3fc   : > { %v755_v7 = vsel %vm754_vm10, %v751_v11, %v753_v6  ;;  %v756_v12 = vsel %vm754_vm10, %v753_v6, %v751_v11  ;;  %vm1138_vm10 = vcmp.lt.s32.totalorder %v2641_v23, 13 }
 0x3fd   : > { %v770_v13 = vmul.f32 %v1990_v52, %v756_v12  ;;  %v771_v14 = vmul.f32 %v767_v61, %v755_v7  ;;  %1511 = vrot.lane.b32.xlu0 %v2716_v19, %s2394_s16  ;;  %1465 = vrot.lane.b32.xlu1 %v2718_v21, %s2392_s24  ;;  %v911_v12 = vcombine.high %v1996_v59, %v1996_v59  ;;  %s2404_s24 = smov 79  }
 0x3ff   : > { %v772_v17 = vadd.f32 %v770_v13, %v748_v63  ;;  %v773_v18 = vadd.f32 %v771_v14, %v749_v3  ;;  %v823_v20 = vpop.permute.xlu0 %822  ;;  %v777_v22 = vpop.permute.xlu1 %776  ;;  %v1997_v13 = vld.sshfl [vmem:[#allocation6 + $0x2c] sm:$0x33 pattern:$0x76325410] }
 0x400   : > { %v779_v24 = vsel %vm778_vm11, %v775_v55, %v777_v22  ;;  %v780_v25 = vsel %vm778_vm11, %v777_v22, %v775_v55  ;;  %vm1162_vm11 = vcmp.lt.s32.totalorder %v2641_v23, 3 }
 0x401   : > { %v794_v26 = vmul.f32 %v1991_v62, %v780_v25  ;;  %v795_v27 = vmul.f32 %v791_v15, %v779_v24  ;;  %1535 = vrot.lane.b32.xlu0 %v2716_v19, %s2395_s25  ;;  %1489 = vrot.lane.b32.xlu1 %v2718_v21, %s2393_s15  ;;  %v935_v25 = vcombine.high %v1997_v13, %v1997_v13  ;;  %s2405_s15 = smov 78  }
 0x403   : > { %v796_v30 = vadd.f32 %v794_v26, %v772_v17  ;;  %v797_v31 = vadd.f32 %v795_v27, %v773_v18  ;;  %v847_v32 = vpop.permute.xlu0 %846  ;;  %v801_v33 = vpop.permute.xlu1 %800  ;;  %v1998_v26 = vld.sshfl [vmem:[#allocation6 + $0x30] sm:$0x33 pattern:$0x76325410] }
 0x404   : > { %v803_v34 = vsel %vm802_vm12, %v799_v4, %v801_v33  ;;  %v804_v41 = vsel %vm802_vm12, %v801_v33, %v799_v4  ;;  %vm1186_vm12 = vcmp.lt.s32.totalorder %v2641_v23, 2 }
 0x405   : > { %v818_v2 = vmul.f32 %v1992_v16, %v804_v41  ;;  %v819_v5 = vmul.f32 %v815_v28, %v803_v34  ;;  %1559 = vrot.lane.b32.xlu0 %v2716_v19, %s2396_s23  ;;  %1513 = vrot.lane.b32.xlu1 %v2718_v21, %s2394_s16  ;;  %v959_v41 = vcombine.high %v1998_v26, %v1998_v26  ;;  %s2406_s16 = smov 77  }
 0x407   : > { %v820_v9 = vadd.f32 %v818_v2, %v796_v30  ;;  %v821_v43 = vadd.f32 %v819_v5, %v797_v31  ;;  %v871_v44 = vpop.permute.xlu0 %870  ;;  %v825_v10 = vpop.permute.xlu1 %824  ;;  %v1999_v2 = vld.sshfl [vmem:[#allocation6 + $0x34] sm:$0x33 pattern:$0x76325410] }
 0x408   : > { %v827_v45 = vsel %vm826_vm13, %v823_v20, %v825_v10  ;;  %v828_v11 = vsel %vm826_vm13, %v825_v10, %v823_v20  ;;  %vm1210_vm13 = vcmp.lt.s32.totalorder %v2641_v23, 1 }
 0x409   : > { %v842_v46 = vmul.f32 %v1993_v29, %v828_v11  ;;  %v843_v47 = vmul.f32 %v839_v1, %v827_v45  ;;  %1583 = vrot.lane.b32.xlu0 %v2716_v19, %s2397_s12  ;;  %1537 = vrot.lane.b32.xlu1 %v2718_v21, %s2395_s25  ;;  %v983_v11 = vcombine.high %v1999_v2, %v1999_v2  ;;  %s323_s25 = sld [smem:[#allocation2]] }
 0x40b   : > { %v844_v50 = vadd.f32 %v842_v46, %v820_v9  ;;  %v845_v51 = vadd.f32 %v843_v47, %v821_v43  ;;  %v895_v52 = vpop.permute.xlu0 %894  ;;  %v849_v53 = vpop.permute.xlu1 %848  ;;  %v2000_v46 = vld.sshfl [vmem:[#allocation6 + $0x38] sm:$0x33 pattern:$0x76325410] }
 0x40c   : > { %v851_v54 = vsel %vm850_vm14, %v847_v32, %v849_v53  ;;  %v852_v55 = vsel %vm850_vm14, %v849_v53, %v847_v32  ;;  %vm1251_vm14 = vcmp.lt.s32.totalorder %v2641_v23, 127 }
 0x40d   : > { %v866_v56 = vmul.f32 %v1994_v8, %v852_v55  ;;  %v867_v57 = vmul.f32 %v863_v48, %v851_v54  ;;  %1607 = vrot.lane.b32.xlu0 %v2716_v19, %s2398_s11  ;;  %1561 = vrot.lane.b32.xlu1 %v2718_v21, %s2396_s23  ;;  %v1007_v55 = vcombine.high %v2000_v46, %v2000_v46  ;;  %s2043_s23 = sshll.u32 %s2473_s6, 10  ;;  %s1870_s6 = scalar_lea.sflag [#allocation5], %s2591_s21 }
 0x40f   : > { %v868_v60 = vadd.f32 %v866_v56, %v844_v50  ;;  %v869_v61 = vadd.f32 %v867_v57, %v845_v51  ;;  %v919_v62 = vpop.permute.xlu0 %918  ;;  %v873_v63 = vpop.permute.xlu1 %872 }
 0x410   : > { %v875_v3 = vsel %vm874_vm15, %v871_v44, %v873_v63  ;;  %v876_v4 = vsel %vm874_vm15, %v873_v63, %v871_v44  ;;  %vm1275_vm15 = vcmp.lt.s32.totalorder %v2641_v23, 126 }
 0x411   : > { %v890_v6 = vmul.f32 %v1995_v49, %v876_v4  ;;  %v891_v7 = vmul.f32 %v887_v58, %v875_v3  ;;  %1631 = vrot.lane.b32.xlu0 %v2716_v19, %s2399_s30  ;;  %1585 = vrot.lane.b32.xlu1 %v2718_v21, %s2397_s12  ;;  %s312_s12 = scalar_lea.vmem [#allocation8], %s1974_s22 }
 0x413   : > { %v892_v14 = vadd.f32 %v890_v6, %v868_v60  ;;  %v893_v15 = vadd.f32 %v891_v7, %v869_v61  ;;  %v943_v16 = vpop.permute.xlu0 %942  ;;  %v897_v17 = vpop.permute.xlu1 %896 }
 0x414   : > { %v899_v18 = vsel %vm898_vm0, %v895_v52, %v897_v17  ;;  %v900_v20 = vsel %vm898_vm0, %v897_v17, %v895_v52  ;;  %vm1299_vm0 = vcmp.lt.s32.totalorder %v2641_v23, 125 }
 0x415   : > { %v914_v22 = vmul.f32 %v1996_v59, %v900_v20  ;;  %v915_v24 = vmul.f32 %v911_v12, %v899_v18  ;;  %1655 = vrot.lane.b32.xlu0 %v2716_v19, %s2400_s17  ;;  %1609 = vrot.lane.b32.xlu1 %v2718_v21, %s2398_s11  ;;  %s1883_s11 = sshll.u32 %s312_s12, 4  ;;  %s3172_s11 = int_to_ptr.vmem [resolvable:$true] %s1883_s11 }
 0x416   : > { %s2277_s22 = scalar_lea.vmem %s3172_s11, 1024 }
 0x417   : > { %v916_v27 = vadd.f32 %v914_v22, %v892_v14  ;;  %v917_v28 = vadd.f32 %v915_v24, %v893_v15  ;;  %v967_v29 = vpop.permute.xlu0 %966  ;;  %v921_v30 = vpop.permute.xlu1 %920  ;;  %p2278_p4 = scmp.ne.s32.totalorder %s3172_s11, %s2277_s22 }
 0x418   : > { %v923_v31 = vsel %vm922_vm1, %v919_v62, %v921_v30  ;;  %v924_v32 = vsel %vm922_vm1, %v921_v30, %v919_v62  ;;  %vm1323_vm1 = vcmp.lt.s32.totalorder %v2641_v23, 115 }
 0x419   : > { %v938_v33 = vmul.f32 %v1997_v13, %v924_v32  ;;  %v939_v34 = vmul.f32 %v935_v25, %v923_v31  ;;  %1679 = vrot.lane.b32.xlu0 %v2716_v19, %s2401_s20  ;;  %1633 = vrot.lane.b32.xlu1 %v2718_v21, %s2399_s30  ;;  %p2279_p6 = pnand %p2278_p4, %p2543_p12 }
 0x41b   : > { %v940_v5 = vadd.f32 %v938_v33, %v916_v27  ;;  %v941_v1 = vadd.f32 %v939_v34, %v917_v28  ;;  %v991_v8 = vpop.permute.xlu0 %990  ;;  %v945_v9 = vpop.permute.xlu1 %944  ;;  %p2280_p8 = pneg %p2279_p6 }
 0x41c   : > { %v947_v43 = vsel %vm946_vm2, %v943_v16, %v945_v9  ;;  %v948_v44 = vsel %vm946_vm2, %v945_v9, %v943_v16  ;;  %vm1347_vm2 = vcmp.lt.s32.totalorder %v2641_v23, 114 }
 0x41d   : > { %v962_v10 = vmul.f32 %v1998_v26, %v948_v44  ;;  %v963_v45 = vmul.f32 %v959_v41, %v947_v43  ;;  %1703 = vrot.lane.b32.xlu0 %v2716_v19, %s2402_s8  ;;  %1657 = vrot.lane.b32.xlu1 %v2718_v21, %s2400_s17  ;;  %v2002_v44 = vld.sshfl [vmem:[#allocation6 + $0x40] sm:$0x33 pattern:$0x76325410] }
 0x41f   : > { %v964_v47 = vadd.f32 %v962_v10, %v940_v5  ;;  %v965_v48 = vadd.f32 %v963_v45, %v941_v1  ;;  %v2843_v49 = vpop.permute.xlu0 %1014  ;;  %v969_v50 = vpop.permute.xlu1 %968 }
 0x420   : > { %v971_v51 = vsel %vm970_vm3, %v967_v29, %v969_v50  ;;  %v972_v52 = vsel %vm970_vm3, %v969_v50, %v967_v29  ;;  %vm1371_vm3 = vcmp.lt.s32.totalorder %v2641_v23, 113 }
 0x421   : > { %v986_v53 = vmul.f32 %v1999_v2, %v972_v52  ;;  %v987_v54 = vmul.f32 %v983_v11, %v971_v51  ;;  %1727 = vrot.lane.b32.xlu0 %v2716_v19, %s2403_s10  ;;  %1681 = vrot.lane.b32.xlu1 %v2718_v21, %s2401_s20  ;;  %s3166_s20 = scalar_lea.hbm %s3224_s7, %s2043_s23 }
 0x423   : > { %v988_v56 = vadd.f32 %v986_v53, %v964_v47  ;;  %v989_v57 = vadd.f32 %v987_v54, %v965_v48  ;;  %v1039_v58 = vpop.permute.xlu0 %1038  ;;  %v993_v59 = vpop.permute.xlu1 %992  ;;  %v1055_v47 = vcombine.high %v2002_v44, %v2002_v44  ;;  %v2004_v53 = vld.sshfl [vmem:[#allocation6 + $0x48] sm:$0x33 pattern:$0x76325410] }
 0x424   : > { %v995_v60 = vsel %vm994_vm4, %v991_v8, %v993_v59  ;;  %v996_v61 = vsel %vm994_vm4, %v993_v59, %v991_v8  ;;  %v2001_v8 = vld.sshfl [vmem:[#allocation6 + $0x3c] sm:$0x33 pattern:$0x76325410]  ;;  %vm1395_vm4 = vcmp.lt.s32.totalorder %v2641_v23, 112 }
 0x425   : > { %v1010_v62 = vmul.f32 %v2000_v46, %v996_v61  ;;  %v1011_v63 = vmul.f32 %v1007_v55, %v995_v60  ;;  %1751 = vrot.lane.b32.xlu0 %v2716_v19, %s2404_s24  ;;  %1705 = vrot.lane.b32.xlu1 %v2718_v21, %s2402_s8  ;;  %v1031_v10 = vcombine.high %v2001_v8, %v2001_v8  ;;  %v2003_v46 = vld.sshfl [vmem:[#allocation6 + $0x44] sm:$0x33 pattern:$0x76325410]  ;;  %s2407_s8 = smov [#allocation8]  }
 0x427   : > { %v2851_v3 = vadd.f32 %v1010_v62, %v988_v56  ;;  %v2853_v4 = vadd.f32 %v1011_v63, %v989_v57  ;;  %v1063_v6 = vpop.permute.xlu0 %1062  ;;  %v1017_v7 = vpop.permute.xlu1 %1016  ;;  %v1079_v56 = vcombine.high %v2003_v46, %v2003_v46  ;;  %v2005_v57 = vld.sshfl [vmem:[#allocation6 + $0x4c] sm:$0x33 pattern:$0x76325410]  ;;  %v1103_v62 = vcombine.high %v2004_v53, %v2004_v53 }
 0x428   : > { %v1019_v45 = vsel %vm1018_vm5, %v2843_v49, %v1017_v7  ;;  %v1020_v11 = vsel %vm1018_vm5, %v1017_v7, %v2843_v49  ;;  %v2006_v63 = vld.sshfl [vmem:[#allocation6 + $0x50] sm:$0x33 pattern:$0x76325410]  ;;  %vm1419_vm5 = vcmp.lt.s32.totalorder %v2641_v23, 111 }
 0x429   : > { %1775 = vrot.lane.b32.xlu0 %v2716_v19, %s2405_s15  ;;  %1729 = vrot.lane.b32.xlu1 %v2718_v21, %s2403_s10  ;;  %v1034_v54 = vmul.f32 %v2001_v8, %v1020_v11  ;;  %v1035_v55 = vmul.f32 %v1031_v10, %v1019_v45  ;;  %v1127_v8 = vcombine.high %v2005_v57, %v2005_v57  ;;  %s2281_s10 = sshll.u32 %s2407_s8, 4  ;;  %s2282_s10 = int_to_ptr.vmem [resolvable:$false] %s2281_s10 }
 0x42a   : > { %p2284_p10 = scmp.lt.s32.totalorder %s3172_s11, %s2282_s10 }
 0x42b   : > { %v1087_v12 = vpop.permute.xlu0 %1086  ;;  %v1041_v13 = vpop.permute.xlu1 %1040  ;;  %v1036_v10 = vadd.f32 %v1034_v54, %v2851_v3  ;;  %v1037_v45 = vadd.f32 %v1035_v55, %v2853_v4 }
 0x42c   : > { %v1043_v51 = vsel %vm1042_vm6, %v1039_v58, %v1041_v13  ;;  %v1044_v52 = vsel %vm1042_vm6, %v1041_v13, %v1039_v58  ;;  %vm1443_vm6 = vcmp.lt.s32.totalorder %v2641_v23, 110 }
 0x42d   : > { %1799 = vrot.lane.b32.xlu0 %v2716_v19, %s2406_s16  ;;  %1753 = vrot.lane.b32.xlu1 %v2718_v21, %s2404_s24  ;;  %v1058_v49 = vmul.f32 %v2002_v44, %v1044_v52  ;;  %v1059_v61 = vmul.f32 %v1055_v47, %v1043_v51  ;;  %v2007_v44 = vld.sshfl [vmem:[#allocation6 + $0x54] sm:$0x33 pattern:$0x76325410]  ;;  %v1151_v51 = vcombine.high %v2006_v63, %v2006_v63  ;;  %s2283_s24 = scalar_lea.vmem %s2282_s10, 2048 }
 0x42e   : > { %p2285_p13 = scmp.lt.s32.totalorder %s2283_s24, %s2277_s22 }
 0x42f   : > { %v2859_v14 = vpop.permute.xlu0 %1110  ;;  %v1065_v15 = vpop.permute.xlu1 %1064  ;;  %v1060_v52 = vadd.f32 %v1058_v49, %v1036_v10  ;;  %v1061_v0 = vadd.f32 %v1059_v61, %v1037_v45  ;;  %v1199_v49 = vcombine.high %v2008_v36, %v2008_v36 }
 0x430   : > { %v1067_v59 = vsel %vm1066_vm7, %v1063_v6, %v1065_v15  ;;  %v1068_v60 = vsel %vm1066_vm7, %v1065_v15, %v1063_v6  ;;  %vm1467_vm7 = vcmp.lt.s32.totalorder %v2641_v23, 109  ;;  %p2286_p3 = por %p2285_p13, %p2284_p10 }
 0x431   : > { %1777 = vrot.lane.b32.xlu1 %v2718_v21, %s2405_s15  ;;  %v1082_v6 = vmul.f32 %v2003_v46, %v1068_v60  ;;  %v1083_v15 = vmul.f32 %v1079_v56, %v1067_v59  ;;  %v2009_v56 = vld.sshfl [vmem:[#allocation6 + $0x5c] sm:$0x33 pattern:$0x76325410] }
 0x432   : > { %p2287_p7 = pnand %p2286_p3, %p2280_p8 }
 0x433   : > { %v2862_v16 = vpop.permute.xlu0 %1134  ;;  %v1089_v17 = vpop.permute.xlu1 %1088  ;;  %v1084_v46 = vadd.f32 %v1082_v6, %v1060_v52 }
 0x434   : > { %v1091_v58 = vsel %vm1090_vm8, %v1087_v12, %v1089_v17  ;;  %v1092_v13 = vsel %vm1090_vm8, %v1089_v17, %v1087_v12  ;;  %vm1491_vm8 = vcmp.lt.s32.totalorder %v2641_v23, 99 }
 0x435   : > { %1801 = vrot.lane.b32.xlu1 %v2718_v21, %s2406_s16  ;;  %v1106_v12 = vmul.f32 %v2004_v53, %v1092_v13  ;;  %v1107_v17 = vmul.f32 %v1103_v62, %v1091_v58  ;;  %v1085_v53 = vadd.f32 %v1083_v15, %v1061_v0 }
 0x437   : > { %v2865_v18 = vpop.permute.xlu0 %1158  ;;  %v1113_v20 = vpop.permute.xlu1 %1112 }
 0x438   : > { %v1115_v11 = vsel %vm1114_vm9, %v2859_v14, %v1113_v20  ;;  %v1116_v47 = vsel %vm1114_vm9, %v1113_v20, %v2859_v14  ;;  %v1175_v20 = vcombine.high %v2007_v44, %v2007_v44  ;;  %vm1515_vm9 = vcmp.lt.s32.totalorder %v2641_v23, 98 }
 0x439   : > { %v1130_v54 = vmul.f32 %v2005_v57, %v1116_v47  ;;  %v1131_v55 = vmul.f32 %v1127_v8, %v1115_v11 }
 0x43b   : > { %v2867_v22 = vpop.permute.xlu0 %1182  ;;  %v2869_v24 = vpop.permute.xlu1 %1136 }
 0x43c   : > { %v1139_v4 = vsel %vm1138_vm10, %v2862_v16, %v2869_v24  ;;  %v1140_v14 = vsel %vm1138_vm10, %v2869_v24, %v2862_v16  ;;  %v1108_v16 = vadd.f32 %v1106_v12, %v1084_v46  ;;  %v1109_v24 = vadd.f32 %v1107_v17, %v1085_v53 }
 0x43d   : > { %v1154_v61 = vmul.f32 %v2006_v63, %v1140_v14  ;;  %v1155_v0 = vmul.f32 %v1151_v51, %v1139_v4  ;;  %v2011_v14 = vld.sshfl [vmem:[#allocation6 + $0x64] sm:$0x33 pattern:$0x76325410]  ;;  %vm1539_vm10 = vcmp.lt.s32.totalorder %v2641_v23, 97 }
 0x43e   : > { %v1132_v13 = vadd.f32 %v1130_v54, %v1108_v16  ;;  %v1133_v8 = vadd.f32 %v1131_v55, %v1109_v24 }
 0x43f   : > { %v2871_v25 = vpop.permute.xlu0 %1206  ;;  %v2873_v26 = vpop.permute.xlu1 %1160 }
 0x440   : > { %v1163_v59 = vsel %vm1162_vm11, %v2865_v18, %v2873_v26  ;;  %v1164_v60 = vsel %vm1162_vm11, %v2873_v26, %v2865_v18  ;;  %v1223_v26 = vcombine.high %v2009_v56, %v2009_v56  ;;  %v1156_v15 = vadd.f32 %v1154_v61, %v1132_v13 }
 0x441   : > { %v1178_v10 = vmul.f32 %v2007_v44, %v1164_v60  ;;  %v1179_v63 = vmul.f32 %v1175_v20, %v1163_v59  ;;  %v1157_v11 = vadd.f32 %v1155_v0, %v1133_v8  ;;  %v1264_v59 = vcombine.high %v2011_v14, %v2011_v14  ;;  %v2013_v60 = vld.sshfl [vmem:[#allocation6 + $0x6c] sm:$0x33 pattern:$0x76325410] }
 0x442   : > { %v1312_v13 = vcombine.high %v2013_v60, %v2013_v60  ;;  %vm1563_vm11 = vcmp.lt.s32.totalorder %v2641_v23, 96 }
 0x443   : > { %v2875_v27 = vpop.permute.xlu0 %1247  ;;  %v2877_v28 = vpop.permute.xlu1 %1184  ;;  %v1181_v17 = vadd.f32 %v1179_v63, %v1157_v11 }
 0x444   : > { %v1187_v58 = vsel %vm1186_vm12, %v2867_v22, %v2877_v28  ;;  %v1188_v18 = vsel %vm1186_vm12, %v2877_v28, %v2867_v22  ;;  %v2010_v22 = vld.sshfl [vmem:[#allocation6 + $0x60] sm:$0x33 pattern:$0x76325410]  ;;  %v1180_v28 = vadd.f32 %v1178_v10, %v1156_v15  ;;  %vm1587_vm12 = vcmp.lt.s32.totalorder %v2641_v23, 95 }
 0x445   : > { %v1202_v47 = vmul.f32 %v2008_v36, %v1188_v18  ;;  %v1203_v51 = vmul.f32 %v1199_v49, %v1187_v58  ;;  %v1240_v53 = vcombine.high %v2010_v22, %v2010_v22  ;;  %v2012_v36 = vld.sshfl [vmem:[#allocation6 + $0x68] sm:$0x33 pattern:$0x76325410]  ;;  %v1243_v24 = vmul.f32 %v2010_v22, %v2716_v19 }
 0x446   : > { %v1288_v61 = vcombine.high %v2012_v36, %v2012_v36  ;;  %v2015_v10 = vld.sshfl [vmem:[#allocation6 + $0x74] sm:$0x33 pattern:$0x76325410] }
 0x447   : > { %v2879_v29 = vpop.permute.xlu0 %1271  ;;  %v2881_v30 = vpop.permute.xlu1 %1208  ;;  %v1204_v20 = vadd.f32 %v1202_v47, %v1180_v28  ;;  %v1205_v46 = vadd.f32 %v1203_v51, %v1181_v17  ;;  %v1244_v16 = vmul.f32 %v1240_v53, %v2718_v21 }
 0x448   : > { %v1211_v45 = vsel %vm1210_vm13, %v2871_v25, %v2881_v30  ;;  %v1212_v6 = vsel %vm1210_vm13, %v2881_v30, %v2871_v25  ;;  %vm1611_vm13 = vcmp.lt.s32.totalorder %v2641_v23, 94 }
 0x449   : > { %v1226_v4 = vmul.f32 %v2009_v56, %v1212_v6  ;;  %v1227_v44 = vmul.f32 %v1223_v26, %v1211_v45 }
 0x44b   : > { %v2883_v31 = vpop.permute.xlu0 %1295  ;;  %v2885_v32 = vpop.permute.xlu1 %1249  ;;  %v1228_v54 = vadd.f32 %v1226_v4, %v1204_v20  ;;  %v1229_v55 = vadd.f32 %v1227_v44, %v1205_v46  ;;  %v2017_v44 = vld.sshfl [vmem:[#allocation6 + $0x7c] sm:$0x33 pattern:$0x76325410] }
 0x44c   : > { %v1252_v56 = vsel %vm1251_vm14, %v2875_v27, %v2885_v32  ;;  %v1253_v49 = vsel %vm1251_vm14, %v2885_v32, %v2875_v27  ;;  %v2014_v27 = vld.sshfl [vmem:[#allocation6 + $0x70] sm:$0x33 pattern:$0x76325410]  ;;  %vm1635_vm14 = vcmp.lt.s32.totalorder %v2641_v23, 93 }
 0x44d   : > { %v1246_v21 = vadd.f32 %v1244_v16, %v1229_v55  ;;  %v1245_v32 = vadd.f32 %v1243_v24, %v1228_v54  ;;  %v1267_v19 = vmul.f32 %v2011_v14, %v1252_v56  ;;  %v1268_v8 = vmul.f32 %v1264_v59, %v1253_v49  ;;  %v2018_v54 = vld.sshfl [vmem:[#allocation6 + $0x80] sm:$0x33 pattern:$0x76325410] }
 0x44e   : > { %v1336_v11 = vcombine.high %v2014_v27, %v2014_v27 }
 0x44f   : > { %v2887_v33 = vpop.permute.xlu0 %1319  ;;  %v2889_v34 = vpop.permute.xlu1 %1273  ;;  %v1269_v22 = vadd.f32 %v1267_v19, %v1245_v32  ;;  %v1270_v28 = vadd.f32 %v1268_v8, %v1246_v21  ;;  %v2020_v32 = vld.sshfl [vmem:[#allocation6 + $0x88] sm:$0x33 pattern:$0x76325410] }
 0x450   : > { %v1276_v18 = vsel %vm1275_vm15, %v2879_v29, %v2889_v34  ;;  %v1277_v26 = vsel %vm1275_vm15, %v2889_v34, %v2879_v29  ;;  %v2016_v29 = vld.sshfl [vmem:[#allocation6 + $0x78] sm:$0x33 pattern:$0x76325410]  ;;  %vm1659_vm15 = vcmp.lt.s32.totalorder %v2641_v23, 83 }
 0x451   : > { %v1291_v6 = vmul.f32 %v2012_v36, %v1276_v18  ;;  %v1292_v15 = vmul.f32 %v1288_v61, %v1277_v26  ;;  %v1384_v46 = vcombine.high %v2016_v29, %v2016_v29  ;;  %v2019_v61 = vld.sshfl [vmem:[#allocation6 + $0x84] sm:$0x33 pattern:$0x76325410] }
 0x453   : > { %v2891_v41 = vpop.permute.xlu0 %1343  ;;  %v2893_v2 = vpop.permute.xlu1 %1297  ;;  %v1293_v53 = vadd.f32 %v1291_v6, %v1269_v22  ;;  %v1294_v36 = vadd.f32 %v1292_v15, %v1270_v28  ;;  %v2022_v28 = vld.sshfl [vmem:[#allocation6 + $0x90] sm:$0x33 pattern:$0x76325410] }
 0x454   : > { %v1300_v63 = vsel %vm1299_vm0, %v2883_v31, %v2893_v2  ;;  %v1301_v45 = vsel %vm1299_vm0, %v2893_v2, %v2883_v31  ;;  %v1360_v2 = vcombine.high %v2015_v10, %v2015_v10  ;;  %vm1683_vm0 = vcmp.lt.s32.totalorder %v2641_v23, 82 }
 0x455   : > { %v1315_v17 = vmul.f32 %v2013_v60, %v1300_v63  ;;  %v1316_v4 = vmul.f32 %v1312_v13, %v1301_v45  ;;  %v1432_v13 = vcombine.high %v2018_v54, %v2018_v54 }
 0x457   : > { %v2895_v5 = vpop.permute.xlu0 %1367  ;;  %v2897_v1 = vpop.permute.xlu1 %1321  ;;  %v1317_v56 = vadd.f32 %v1315_v17, %v1293_v53  ;;  %v1318_v49 = vadd.f32 %v1316_v4, %v1294_v36  ;;  %v2023_v36 = vld.sshfl [vmem:[#allocation6 + $0x94] sm:$0x33 pattern:$0x76325410] }
 0x458   : > { %v1324_v51 = vsel %vm1323_vm1, %v2887_v33, %v2897_v1  ;;  %v1325_v31 = vsel %vm1323_vm1, %v2897_v1, %v2887_v33  ;;  %vm1707_vm1 = vcmp.lt.s32.totalorder %v2641_v23, 81 }
 0x459   : > { %v1339_v33 = vmul.f32 %v2014_v27, %v1324_v51  ;;  %v1340_v1 = vmul.f32 %v1336_v11, %v1325_v31  ;;  %v2021_v11 = vld.sshfl [vmem:[#allocation6 + $0x8c] sm:$0x33 pattern:$0x76325410]  ;;  %v1480_v31 = vcombine.high %v2020_v32, %v2020_v32 }
 0x45b   : > { %v2900_v9 = vpop.permute.xlu0 %1391  ;;  %v2902_v43 = vpop.permute.xlu1 %1345 }
 0x45c   : > { %v1348_v14 = vsel %vm1347_vm2, %v2891_v41, %v2902_v43  ;;  %v1349_v20 = vsel %vm1347_vm2, %v2902_v43, %v2891_v41  ;;  %v1408_v43 = vcombine.high %v2017_v44, %v2017_v44  ;;  %vm1731_vm2 = vcmp.lt.s32.totalorder %v2641_v23, 80 }
 0x45d   : > { %v1363_v16 = vmul.f32 %v2015_v10, %v1348_v14  ;;  %v1364_v24 = vmul.f32 %v1360_v2, %v1349_v20 }
 0x45f   : > { %v2908_v48 = vpop.permute.xlu0 %1415  ;;  %v2910_v50 = vpop.permute.xlu1 %1369 }
 0x460   : > { %v1372_v60 = vsel %vm1371_vm3, %v2895_v5, %v2910_v50  ;;  %v1373_v41 = vsel %vm1371_vm3, %v2910_v50, %v2895_v5  ;;  %v1341_v5 = vadd.f32 %v1339_v33, %v1317_v56  ;;  %v1342_v50 = vadd.f32 %v1340_v1, %v1318_v49 }
 0x461   : > { %v1387_v27 = vmul.f32 %v2016_v29, %v1372_v60  ;;  %v1388_v21 = vmul.f32 %v1384_v46, %v1373_v41  ;;  %vm1755_vm3 = vcmp.lt.s32.totalorder %v2641_v23, 79 }
 0x462   : > { %v1365_v63 = vadd.f32 %v1363_v16, %v1341_v5  ;;  %v1366_v45 = vadd.f32 %v1364_v24, %v1342_v50 }
 0x463   : > { %v2914_v7 = vpop.permute.xlu0 %1439  ;;  %v2916_v40 = vpop.permute.xlu1 %1393 }
 0x464   : > { %v1396_v18 = vsel %vm1395_vm4, %v2900_v9, %v2916_v40  ;;  %v1397_v26 = vsel %vm1395_vm4, %v2916_v40, %v2900_v9  ;;  %v1456_v9 = vcombine.high %v2019_v61, %v2019_v61  ;;  %vm1779_vm4 = vcmp.lt.s32.totalorder %v2641_v23, 78 }
 0x465   : > { %v1411_v6 = vmul.f32 %v2017_v44, %v1396_v18  ;;  %v1412_v15 = vmul.f32 %v1408_v43, %v1397_v26  ;;  %v2024_v43 = vld.sshfl [vmem:[#allocation6 + $0x98] sm:$0x33 pattern:$0x76325410] }
 0x467   : > { %v2924_v38 = vpop.permute.xlu0 %1463  ;;  %v2926_v3 = vpop.permute.xlu1 %1417 }
 0x468   : > { %v1420_v10 = vsel %vm1419_vm5, %v2908_v48, %v2926_v3  ;;  %v1421_v40 = vsel %vm1419_vm5, %v2926_v3, %v2908_v48  ;;  %v1389_v48 = vadd.f32 %v1387_v27, %v1365_v63  ;;  %v1390_v3 = vadd.f32 %v1388_v21, %v1366_v45 }
 0x469   : > { %v1435_v2 = vmul.f32 %v2018_v54, %v1420_v10  ;;  %v1436_v22 = vmul.f32 %v1432_v13, %v1421_v40  ;;  %v1528_v54 = vcombine.high %v2022_v28, %v2022_v28  ;;  %v2025_v13 = vld.sshfl [vmem:[#allocation6 + $0x9c] sm:$0x33 pattern:$0x76325410]  ;;  %v1576_v27 = vcombine.high %v2024_v43, %v2024_v43 }
 0x46a   : > { %v1413_v14 = vadd.f32 %v1411_v6, %v1389_v48  ;;  %v1414_v20 = vadd.f32 %v1412_v15, %v1390_v3  ;;  %v2026_v10 = vld.sshfl [vmem:[#allocation6 + $0xa0] sm:$0x33 pattern:$0x76325410]  ;;  %vm1803_vm5 = vcmp.lt.s32.totalorder %v2641_v23, 77 }
 0x46b   : > { %v2946_v57 = vpop.permute.xlu0 %1487  ;;  %v2948_v62 = vpop.permute.xlu1 %1441  ;;  %v1624_v48 = vcombine.high %v2026_v10, %v2026_v10 }
 0x46c   : > { %v1444_v29 = vsel %vm1443_vm6, %v2914_v7, %v2948_v62  ;;  %v1445_v51 = vsel %vm1443_vm6, %v2948_v62, %v2914_v7  ;;  %v1504_v62 = vcombine.high %v2021_v11, %v2021_v11  ;;  %vm1823_vm6 = vcmask 1041408  }
 0x46d   : > { %v1459_v46 = vmul.f32 %v2019_v61, %v1444_v29  ;;  %v1460_v53 = vmul.f32 %v1456_v9, %v1445_v51  ;;  %v2027_v29 = vld.sshfl [vmem:[#allocation6 + $0xa4] sm:$0x33 pattern:$0x76325410] }
 0x46f   : > { %v2962_v52 = vpop.permute.xlu0 %1511  ;;  %v2964_v12 = vpop.permute.xlu1 %1465 }
 0x470   : > { %v1468_v44 = vsel %vm1467_vm7, %v2924_v38, %v2964_v12  ;;  %v1469_v7 = vsel %vm1467_vm7, %v2964_v12, %v2924_v38  ;;  %v1437_v38 = vadd.f32 %v1435_v2, %v1413_v14  ;;  %v1438_v12 = vadd.f32 %v1436_v22, %v1414_v20  ;;  %v2028_v22 = vld.sshfl [vmem:[#allocation6 + $0xa8] sm:$0x33 pattern:$0x76325410] }
 0x471   : > { %v1483_v60 = vmul.f32 %v2020_v32, %v1468_v44  ;;  %v1484_v41 = vmul.f32 %v1480_v31, %v1469_v7 }
 0x472   : > { %v1461_v24 = vadd.f32 %v1459_v46, %v1437_v38  ;;  %v1462_v61 = vadd.f32 %v1460_v53, %v1438_v12  ;;  %v2029_v53 = vld.sshfl [vmem:[#allocation6 + $0xac] sm:$0x33 pattern:$0x76325410] }
 0x473   : > { %v2967_v25 = vpop.permute.xlu0 %1535  ;;  %v2969_v30 = vpop.permute.xlu1 %1489  ;;  %v2030_v12 = vld.sshfl [vmem:[#allocation6 + $0xb0] sm:$0x33 pattern:$0x76325410] }
 0x474   : > { %v1492_v33 = vsel %vm1491_vm8, %v2946_v57, %v2969_v30  ;;  %v1493_v1 = vsel %vm1491_vm8, %v2969_v30, %v2946_v57  ;;  %v1552_v30 = vcombine.high %v2023_v36, %v2023_v36 }
 0x475   : > { %v1507_v18 = vmul.f32 %v2021_v11, %v1492_v33  ;;  %v1508_v26 = vmul.f32 %v1504_v62, %v1493_v1  ;;  %v1648_v62 = vcombine.high %v2027_v29, %v2027_v29  ;;  %v1672_v1 = vcombine.high %v2028_v22, %v2028_v22 }
 0x477   : > { %v2979_v0 = vpop.permute.xlu0 %1559  ;;  %v2981_v58 = vpop.permute.xlu1 %1513 }
 0x478   : > { %v1516_v16 = vsel %vm1515_vm9, %v2962_v52, %v2981_v58  ;;  %v1517_v57 = vsel %vm1515_vm9, %v2981_v58, %v2962_v52  ;;  %v1485_v52 = vadd.f32 %v1483_v60, %v1461_v24  ;;  %v1486_v58 = vadd.f32 %v1484_v41, %v1462_v61  ;;  %v2031_v24 = vld.sshfl [vmem:[#allocation6 + $0xb4] sm:$0x33 pattern:$0x76325410] }
 0x479   : > { %v1531_v21 = vmul.f32 %v2022_v28, %v1516_v16  ;;  %v1532_v32 = vmul.f32 %v1528_v54, %v1517_v57  ;;  %v1696_v16 = vcombine.high %v2029_v53, %v2029_v53 }
 0x47a   : > { %v1509_v45 = vadd.f32 %v1507_v18, %v1485_v52  ;;  %v1510_v6 = vadd.f32 %v1508_v26, %v1486_v58  ;;  %v1720_v26 = vcombine.high %v2030_v12, %v2030_v12  ;;  %v2032_v58 = vld.sshfl [vmem:[#allocation6 + $0xb8] sm:$0x33 pattern:$0x76325410] }
 0x47b   : > { %v2993_v34 = vpop.permute.xlu0 %1583  ;;  %v2995_v47 = vpop.permute.xlu1 %1537 }
 0x47c   : > { %v1540_v5 = vsel %vm1539_vm10, %v2967_v25, %v2995_v47  ;;  %v1541_v50 = vsel %vm1539_vm10, %v2995_v47, %v2967_v25  ;;  %v1600_v47 = vcombine.high %v2025_v13, %v2025_v13 }
 0x47d   : > { %v1555_v15 = vmul.f32 %v2023_v36, %v1540_v5  ;;  %v1556_v11 = vmul.f32 %v1552_v30, %v1541_v50 }
 0x47f   : > { %v3011_v55 = vpop.permute.xlu0 %1607  ;;  %v3013_v59 = vpop.permute.xlu1 %1561 }
 0x480   : > { %v1564_v63 = vsel %vm1563_vm11, %v2979_v0, %v3013_v59  ;;  %v1565_v25 = vsel %vm1563_vm11, %v3013_v59, %v2979_v0  ;;  %v1533_v0 = vadd.f32 %v1531_v21, %v1509_v45  ;;  %v1534_v59 = vadd.f32 %v1532_v32, %v1510_v6 }
 0x481   : > { %v1579_v3 = vmul.f32 %v2024_v43, %v1564_v63  ;;  %v1580_v2 = vmul.f32 %v1576_v27, %v1565_v25 }
 0x483   : > { %v3033_v19 = vpop.permute.xlu0 %1631  ;;  %v3035_v8 = vpop.permute.xlu1 %1585 }
 0x484   : > { %v1588_v51 = vsel %vm1587_vm12, %v2993_v34, %v3035_v8  ;;  %v1589_v31 = vsel %vm1587_vm12, %v3035_v8, %v2993_v34  ;;  %v1557_v34 = vadd.f32 %v1555_v15, %v1533_v0  ;;  %v1558_v8 = vadd.f32 %v1556_v11, %v1534_v59 }
 0x485   : > { %v1603_v14 = vmul.f32 %v2025_v13, %v1588_v51  ;;  %v1604_v20 = vmul.f32 %v1600_v47, %v1589_v31  ;;  %v2033_v47 = vld.sshfl [vmem:[#allocation6 + $0xbc] sm:$0x33 pattern:$0x76325410]  ;;  %v1768_v15 = vcombine.high %v2032_v58, %v2032_v58 }
 0x486   : > { %v1792_v59 = vcombine.high %v2033_v47, %v2033_v47 }
 0x487   : > { %v3055_v17 = vpop.permute.xlu0 %1655  ;;  %v1610_v4 = vpop.permute.xlu1 %1609 }
 0x488   : > { %v1612_v44 = vsel %vm1611_vm13, %v3011_v55, %v1610_v4  ;;  %v1613_v7 = vsel %vm1611_vm13, %v1610_v4, %v3011_v55  ;;  %v1581_v55 = vadd.f32 %v1579_v3, %v1557_v34  ;;  %v1582_v4 = vadd.f32 %v1580_v2, %v1558_v8 }
 0x489   : > { %v1627_v54 = vmul.f32 %v2026_v10, %v1612_v44  ;;  %v1628_v38 = vmul.f32 %v1624_v48, %v1613_v7  ;;  %v1744_v10 = vcombine.high %v2031_v24, %v2031_v24  ;;  %v2034_v7 = vld.sshfl [vmem:[#allocation6 + $0xc0] sm:$0x33 pattern:$0x76325410] }
 0x48b   : > { %v3075_v56 = vpop.permute.xlu0 %1679  ;;  %v1634_v49 = vpop.permute.xlu1 %1633 }
 0x48c   : > { %v1636_v36 = vsel %vm1635_vm14, %v3033_v19, %v1634_v49  ;;  %v1637_v33 = vsel %vm1635_vm14, %v1634_v49, %v3033_v19  ;;  %v1605_v19 = vadd.f32 %v1603_v14, %v1581_v55  ;;  %v1606_v49 = vadd.f32 %v1604_v20, %v1582_v4 }
 0x48d   : > { %v1651_v57 = vmul.f32 %v2027_v29, %v1636_v36  ;;  %v1652_v30 = vmul.f32 %v1648_v62, %v1637_v33  ;;  %v1816_v36 = vcombine.high %v2034_v7, %v2034_v7 }
 0x48e   : > { %v1630_v13 = vadd.f32 %v1628_v38, %v1606_v49 }
 0x48f   : > { %v3095_v40 = vpop.permute.xlu0 %1703  ;;  %v1658_v9 = vpop.permute.xlu1 %1657 }
 0x490   : > { %v1660_v41 = vsel %vm1659_vm15, %v3055_v17, %v1658_v9  ;;  %v1661_v43 = vsel %vm1659_vm15, %v1658_v9, %v3055_v17  ;;  %v1629_v17 = vadd.f32 %v1627_v54, %v1605_v19  ;;  %v1654_v9 = vadd.f32 %v1652_v30, %v1630_v13 }
 0x491   : > { %v1675_v5 = vmul.f32 %v2028_v22, %v1660_v41  ;;  %v1676_v50 = vmul.f32 %v1672_v1, %v1661_v43 }
 0x493   : > { %v1682_v28 = vpop.permute.xlu1 %1681  ;;  %v1728_v46 = vpop.permute.xlu0 %1727  ;;  %v1678_v29 = vadd.f32 %v1676_v50, %v1654_v9 }
 0x494   : > { %v1684_v61 = vsel %vm1683_vm0, %v3075_v56, %v1682_v28  ;;  %v1685_v18 = vsel %vm1683_vm0, %v1682_v28, %v3075_v56  ;;  %v1653_v56 = vadd.f32 %v1651_v57, %v1629_v17 }
 0x495   : > { %v1699_v63 = vmul.f32 %v2029_v53, %v1684_v61  ;;  %v1700_v25 = vmul.f32 %v1696_v16, %v1685_v18 }
 0x496   : > { %v1677_v11 = vadd.f32 %v1675_v5, %v1653_v56 }
 0x497   : > { %v1706_v60 = vpop.permute.xlu1 %1705  ;;  %v1752_v27 = vpop.permute.xlu0 %1751  ;;  %v1702_v2 = vadd.f32 %v1700_v25, %v1678_v29 }
 0x498   : > { %v1708_v21 = vsel %vm1707_vm1, %v3095_v40, %v1706_v60  ;;  %v1709_v32 = vsel %vm1707_vm1, %v1706_v60, %v3095_v40  ;;  %v1701_v3 = vadd.f32 %v1699_v63, %v1677_v11 }
 0x499   : > { %v1723_v51 = vmul.f32 %v2030_v12, %v1708_v21  ;;  %v1724_v31 = vmul.f32 %v1720_v26, %v1709_v32  ;;  %v1838_v32 = vstv %s323_s25 }
 0x49b   : > { %v1730_v52 = vpop.permute.xlu1 %1729  ;;  %v1776_v22 = vpop.permute.xlu0 %1775  ;;  %v1725_v62 = vadd.f32 %v1723_v51, %v1701_v3  ;;  %v1726_v34 = vadd.f32 %v1724_v31, %v1702_v2  ;;  %v3248_v2 = vld [vmem:[#allocation12_spill] sm:$0xff] }
 0x49c   : > { %v1732_v45 = vsel %vm1731_vm2, %v1728_v46, %v1730_v52  ;;  %v1733_v6 = vsel %vm1731_vm2, %v1730_v52, %v1728_v46 }
 0x49d   : > { %v1747_v28 = vmul.f32 %v2031_v24, %v1732_v45  ;;  %v1748_v44 = vmul.f32 %v1744_v10, %v1733_v6 }
 0x49f   : > { %v1754_v40 = vpop.permute.xlu1 %1753  ;;  %v1749_v33 = vadd.f32 %v1747_v28, %v1725_v62  ;;  %v1750_v1 = vadd.f32 %v1748_v44, %v1726_v34  ;;  %v1800_v54 = vpop.permute.xlu0 %1799  ;;  %v3249_v28 = vld [vmem:[#allocation15_spill] sm:$0xff] }
 0x4a0   : > { %v1756_v48 = vsel %vm1755_vm3, %v1752_v27, %v1754_v40  ;;  %v1757_v0 = vsel %vm1755_vm3, %v1754_v40, %v1752_v27 }
 0x4a1   : > { %v1771_v8 = vmul.f32 %v2032_v58, %v1756_v48  ;;  %v1772_v14 = vmul.f32 %v1768_v15, %v1757_v0 }
 0x4a3   : > { %v1778_v20 = vpop.permute.xlu1 %1777  ;;  %v1773_v38 = vadd.f32 %v1771_v8, %v1749_v33  ;;  %v1774_v12 = vadd.f32 %v1772_v14, %v1750_v1 }
 0x4a4   : > { %v1780_v46 = vsel %vm1779_vm4, %v1776_v22, %v1778_v20  ;;  %v1781_v53 = vsel %vm1779_vm4, %v1778_v20, %v1776_v22 }
 0x4a5   : > { %v1795_v55 = vmul.f32 %v2033_v47, %v1780_v46  ;;  %v1796_v4 = vmul.f32 %v1792_v59, %v1781_v53  ;;  %v3247_v59 = vld [vmem:[#allocation13_spill] sm:$0xff] }
 0x4a7   : > { %v1802_v60 = vpop.permute.xlu1 %1801  ;;  %v1797_v16 = vadd.f32 %v1795_v55, %v1773_v38  ;;  %v1798_v19 = vadd.f32 %v1796_v4, %v1774_v12 }
 0x4a8   : > { %v1804_v41 = vsel %vm1803_vm5, %v1800_v54, %v1802_v60  ;;  %v1805_v43 = vsel %vm1803_vm5, %v1802_v60, %v1800_v54 }
 0x4a9   : > { %v1819_v49 = vmul.f32 %v2034_v7, %v1804_v41  ;;  %v1820_v57 = vmul.f32 %v1816_v36, %v1805_v43 }
 0x4ab   : > { %v1821_v30 = vadd.f32 %v1819_v49, %v1797_v16  ;;  %v1822_v24 = vadd.f32 %v1820_v57, %v1798_v19 }
 0x4ad   : > { %v1824_v61 = vsel %vm1823_vm6, %v1821_v30, 0.0  ;;  %v1831_v23 = vsel %vm1823_vm6, %v1822_v24, 0.0 }
 0x4ae   : > { %v1825_v18 = vrot.slane %v1824_v61, 4  ;;  %v1832_v26 = vrot.slane %v1831_v23, 4 }
 0x4b0   : > { %v1826_v17 = vadd.f32 %v1825_v18, %v1824_v61  ;;  %v1833_v13 = vadd.f32 %v1832_v26, %v1831_v23 }
 0x4b2   : > { %v1827_v5 = vrot.slane %v1826_v17, 2  ;;  %v1834_v50 = vrot.slane %v1833_v13, 2 }
 0x4b4   : > { %v1828_v27 = vadd.f32 %v1827_v5, %v1826_v17  ;;  %v1835_v52 = vadd.f32 %v1834_v50, %v1833_v13 }
 0x4b6   : > { %v1829_v58 = vrot.slane %v1828_v27, 1  ;;  %v1836_v21 = vrot.slane %v1835_v52, 1 }
 0x4b8   : > { %v1830_v10 = vadd.f32 %v1829_v58, %v1828_v27  ;;  %v1837_v56 = vadd.f32 %v1836_v21, %v1835_v52 }
 0x4ba   : > { %v1839_v9 = vadd.f32 %v1838_v32, %v1830_v10  ;;  %v1840_v63 = vadd.f32 %v1838_v32, %v1837_v56 }
 0x4bc   : > { %v2035_v25 = vmul.f32 -1.442695, %v1839_v9  ;;  %v2036_v47 = vmul.f32 -1.442695, %v1840_v63 }
 0x4be   : > { %2211 = vpow2.f32 %v2035_v25 }
 0x4bf   : > { %2213 = vpow2.f32 %v2036_v47 }
 0x4c8   : > { %v2212_v45 = vpop.eup %2211 }
 0x4c9   : > { %v2214_v6 = vpop.eup %2213  ;;  %v1847_v15 = vadd.f32 1.0, %v2212_v45 }
 0x4ca   : > { %v1848_v11 = vadd.f32 1.0, %v2214_v6 }
 0x4cb   : > { %2215 = vrcp.f32 %v1847_v15 }
 0x4cc   : > { %2217 = vrcp.f32 %v1848_v11 }
 0x4d5   : > { %v2216_v29 = vpop.eup %2215 }
 0x4d6   : > { %v2218_v51 = vpop.eup %2217  ;;  %v1853_v31 = vmul.f32 %v2216_v29, %v2682_v37  ;;  %v1855_v40 = vmul.f32 %v2216_v29, %v2676_v35  ;;  %v1857_v48 = vmul.f32 %v2216_v29, %v2698_v42  ;;  %v1859_v0 = vmul.f32 %v2216_v29, %v2688_v39  ;;  %v3250_v37 = vld [vmem:[#allocation14_spill] sm:$0xff] }
 0x4d7   : > { %v1854_v3 = vmul.f32 %v2218_v51, %v3247_v59  ;;  %v1856_v22 = vmul.f32 %v2218_v51, %v3248_v2  ;;  %v1858_v44 = vmul.f32 %v2218_v51, %v3249_v28  ;;  %v1860_v7 = vmul.f32 %v2218_v51, %v3250_v37 }
 0x4d8   : > { %1861 = vst [vmem:[%s312_s12] sm:$0xff] %v1853_v31  ;;  %1863 = vst [vmem:[%s312_s12 + $0x10] sm:$0xff] %v1855_v40 }
 0x4d9   : > { %1865 = vst [vmem:[%s312_s12 + $0x20] sm:$0xff] %v1857_v48  ;;  %1867 = vst [vmem:[%s312_s12 + $0x30] sm:$0xff] %v1859_v0 }
 0x4da   : > { %1862 = vst [vmem:[%s312_s12 + $0x8] sm:$0xff] %v1854_v3  ;;  %1864 = vst [vmem:[%s312_s12 + $0x18] sm:$0xff] %v1856_v22 }
 0x4db   : > { %1866 = vst [vmem:[%s312_s12 + $0x28] sm:$0xff] %v1858_v44  ;;  %1868 = vst [vmem:[%s312_s12 + $0x38] sm:$0xff] %v1860_v7 }
 0x4dc   : > { %2290 = shalt.err (!%p2287_p7)
}
 0x4dd   : > { %s2291_s15 = scalar_lea.hbm %s3166_s20, 1024  ;;  %s2295_s23 = scalar_lea.hbm %s3224_s7, 2048 }
 0x4de   : > { %p2292_p9 = scmp.ne.s32.totalorder %s3166_s20, %s2291_s15  ;;  %p2296_p5 = scmp.lt.u32.totalorder %s3166_s20, %s3224_s7 }
 0x4df   : > { %p2297_p11 = scmp.lt.u32.totalorder %s2295_s23, %s2291_s15  ;;  %p2299_p4 = scmp.lt.u32.totalorder %s2291_s15, %s3166_s20 }
 0x4e0   : > { %p2293_p2 = pnand %p2292_p9, %p2543_p12 }
 0x4e1   : > { %p2298_p1 = por %p2297_p11, %p2296_p5 }
 0x4e2   : > { %p2294_p0 = pneg %p2293_p2 }
 0x4e3   : > { %p2300_p6 = por %p2299_p4, %p2298_p1 }
 0x4e5   : > { %p2301_p8 = pnand %p2300_p6, %p2294_p0 }
 0x4e7   : > { %2304 = shalt.err (!%p2301_p8)
}
 0x4e8   : > { %s2408_s17 = smov 256  }
 0x4e9   : > { %2085 = dma.vmem_to_hbm [thread:$0]  (%p2543_p12), %s3172_s11, 1024, %s3166_s20, %s1870_s6, %s2408_s17, %s2408_s17, %s2376_s13  }
 0x4ea PF: > { %s1898_s22 = sand.u32 1, %s2335_s26   ;;  %p3251_p10 = scmp.ne.s32.totalorder %s3233_s9, 0 }
 0x4eb   : > { %p3252_p13 = scmp.ge.s32.totalorder %s2347_s29, 2  ;;  %s1899_s8 = scalar_lea.sflag [#allocation5], %s1898_s22 }
 0x4ed   : > { %p2096_p3 = pnand %p3252_p13, %p3251_p10 }
 0x4ef   : > { %2330 = dma.done.wait (!%p2096_p3), %s1899_s8, 1024  }
 0x4f0   : > { %2332 = vsyncadd (!%p2096_p3), %s1899_s8, 4294966272  ;;  %p22_p7 = scmp.ge.s32.totalorder %s2508_s14, 4   ;;  %s3253_s26 = smov %s2339_s27 }
 0x4f1   : > { %s3254_s27 = smov %s2343_s28  ;;  %s3255_s28 = smov %s2539_s18 }
 0x4f2   : > { %s3256_s29 = smov %s2508_s14  ;;  %24 = sbr.rel (!%p22_p7) target bundleno = 8 (0x8), region = 145 }
 0x4f9   :  { %1904 = vsyncpa [#allocation4], 1 }
 0x4fa   :  { %1906 = vsyncpa [#allocation4 + $0x1], 1 }
 0x4fb   :  { %1907 = vsyncpa [#allocation7], 1 }
 0x4fc   :  { %1908 = vsyncpa [#allocation5], 1 }
 0x4fd   :  { %1910 = vsyncpa [#allocation5 + $0x1], 1 }

</bundles_post_ra>
